<compile_context>
chip_gen: v7x
topology: tpu7x:2x2x1
jax: 0.10.0
libtpu: 0.0.40
codegen_flags: <defaults>
</compile_context>

<pallas_src>
import jax
import jax.numpy as jnp
from jax.experimental import pallas as pl
from jax.experimental.pallas import tpu as pltpu

LANE = 128  # TPU lane width


def _round_up(x, m):
    return (x + m - 1) // m * m


# ----------------------------------------------------------------------------
# Kernel: whole 3-layer MLP on one (TB, S) batch tile, all matmuls on the MXU.
# ----------------------------------------------------------------------------
def qnetwork_kernel(x_ref, w1_ref, b1_ref, w2_ref, b2_ref, w3_ref, b3_ref, o_ref):
    x = x_ref[...]                                                        # (TB, S) bf16
    h1 = jnp.dot(x, w1_ref[...], preferred_element_type=jnp.float32)     # (TB, Hp) f32 acc
    h1 = jnp.maximum(h1 + b1_ref[...], 0.0)                              # bias + ReLU in f32
    h1 = h1.astype(jnp.bfloat16)                                         # downcast at dot boundary
    h2 = jnp.dot(h1, w2_ref[...], preferred_element_type=jnp.float32)    # (TB, Hp)
    h2 = jnp.maximum(h2 + b2_ref[...], 0.0)
    h2 = h2.astype(jnp.bfloat16)
    q = jnp.dot(h2, w3_ref[...], preferred_element_type=jnp.float32)     # (TB, Ap)
    o_ref[...] = (q + b3_ref[...]).astype(o_ref.dtype)


# ----------------------------------------------------------------------------
# Wrapper: batch grid + lane-padded params, slice padding off at the end.
# ----------------------------------------------------------------------------
def qnetwork_forward(state, padded_params, action_size, tb=512):
    """state: (B, state_size) float32. padded_params: output of prepare_params()."""
    w1 = padded_params["w1"]; b1 = padded_params["b1"]
    w2 = padded_params["w2"]; b2 = padded_params["b2"]
    w3 = padded_params["w3"]; b3 = padded_params["b3"]

    B, S = state.shape
    H_pad = w1.shape[1]
    A_pad = w3.shape[1]

    # Tile size: as large as requested, but never larger than the (8-aligned) batch.
    TB = min(tb, _round_up(B, 8))
    B_pad = _round_up(B, TB)

    x = state.astype(jnp.bfloat16)               # halve HBM traffic on the streamed operand
    if B_pad != B:
        x = jnp.pad(x, ((0, B_pad - B), (0, 0)))

    grid = (B_pad // TB,)

    flops = 2 * B_pad * (S * H_pad + H_pad * H_pad + H_pad * A_pad)
    bytes_accessed = (
        B_pad * S * 2                                   # bf16 state in
        + (S * H_pad + H_pad * H_pad + H_pad * A_pad) * 2  # bf16 weights
        + (2 * H_pad + A_pad) * 4                       # f32 biases
        + B_pad * A_pad * 4                             # f32 output
    )

    out = pl.pallas_call(
        qnetwork_kernel,
        out_shape=jax.ShapeDtypeStruct((B_pad, A_pad), jnp.float32),
        grid=grid,
        in_specs=[
            pl.BlockSpec((TB, S), lambda i: (i, 0)),          # streamed batch tile
            pl.BlockSpec((S, H_pad), lambda i: (0, 0)),       # weights resident
            pl.BlockSpec((1, H_pad), lambda i: (0, 0)),
            pl.BlockSpec((H_pad, H_pad), lambda i: (0, 0)),
            pl.BlockSpec((1, H_pad), lambda i: (0, 0)),
            pl.BlockSpec((H_pad, A_pad), lambda i: (0, 0)),
            pl.BlockSpec((1, A_pad), lambda i: (0, 0)),
        ],
        out_specs=pl.BlockSpec((TB, A_pad), lambda i: (i, 0)),
        compiler_params=pltpu.CompilerParams(
            dimension_semantics=("parallel",),               # megacore sharding on v7x
        ),
        cost_estimate=pl.CostEstimate(
            flops=flops, transcendentals=0, bytes_accessed=bytes_accessed
        ),
    )(x, w1, b1, w2, b2, w3, b3)

    return out[:B, :action_size]


# ----------------------------------------------------------------------------
# Parameter construction (PyTorch nn.Linear init, stored transposed) + padding.
# ----------------------------------------------------------------------------
def init_params(state_size, action_size, hidden_size, seed=42):
    """Deterministic synthetic parameters in logical (unpadded) shapes, f32."""
    key = jax.random.PRNGKey(seed)
    ks = jax.random.split(key, 6)

    def lin(kw, kb, fan_in, fan_out):
        bound = 1.0 / jnp.sqrt(fan_in)
        w = jax.random.uniform(kw, (fan_in, fan_out), jnp.float32, -bound, bound)
        b = jax.random.uniform(kb, (1, fan_out), jnp.float32, -bound, bound)
        return w, b

    w1, b1 = lin(ks[0], ks[1], state_size, hidden_size)
    w2, b2 = lin(ks[2], ks[3], hidden_size, hidden_size)
    w3, b3 = lin(ks[4], ks[5], hidden_size, action_size)
    return {"w1": w1, "b1": b1, "w2": w2, "b2": b2, "w3": w3, "b3": b3}


def prepare_params(params):
    """Zero-pad hidden/action dims to 128 lanes; weights -> bf16, biases stay f32."""
    S, H = params["w1"].shape
    A = params["w3"].shape[1]
    H_pad = _round_up(H, LANE)
    A_pad = _round_up(A, LANE)

    def pad2(a, rows, cols):
        return jnp.pad(a, ((0, rows - a.shape[0]), (0, cols - a.shape[1])))

    return {
        "w1": pad2(params["w1"], S, H_pad).astype(jnp.bfloat16),
        "b1": pad2(params["b1"], 1, H_pad),
        "w2": pad2(params["w2"], H_pad, H_pad).astype(jnp.bfloat16),
        "b2": pad2(params["b2"], 1, H_pad),
        "w3": pad2(params["w3"], H_pad, A_pad).astype(jnp.bfloat16),
        "b3": pad2(params["b3"], 1, A_pad),
    }


# ----------------------------------------------------------------------------
# Pure-JAX reference mimicking the kernel's mixed precision.
# ----------------------------------------------------------------------------
def qnetwork_ref(state, pp, action_size):
    f32 = jnp.float32
    x = state.astype(jnp.bfloat16).astype(f32)
    w1 = pp["w1"].astype(f32); w2 = pp["w2"].astype(f32); w3 = pp["w3"].astype(f32)
    h1 = jnp.maximum(x @ w1 + pp["b1"], 0.0).astype(jnp.bfloat16).astype(f32)
    h2 = jnp.maximum(h1 @ w2 + pp["b2"], 0.0).astype(jnp.bfloat16).astype(f32)
    q = h2 @ w3 + pp["b3"]
    return q[:, :action_size]


if __name__ == "__main__":
    state_size, hidden_size, action_size = 16, 32, 4

    params = init_params(state_size, action_size, hidden_size)
    padded = prepare_params(params)

    # Case 1: batch large enough to exercise the batch grid (2 grid steps at TB=512).
    batch = 1024
    state = jax.random.normal(jax.random.PRNGKey(0), (batch, state_size), jnp.float32)
    q = qnetwork_forward(state, padded, action_size, tb=512)
    jax.block_until_ready(q)
    q_ref = qnetwork_ref(state, padded, action_size)
    assert q.shape == (batch, action_size)
    assert jnp.allclose(q, q_ref, atol=1e-2, rtol=1e-2)

    # Case 2: small, non-aligned batch (exercises the pad-and-slice path).
    batch_small = 30
    state_small = jax.random.normal(
        jax.random.PRNGKey(1), (batch_small, state_size), jnp.float32
    )
    q_small = qnetwork_forward(state_small, padded, action_size, tb=512)
    jax.block_until_ready(q_small)
    q_small_ref = qnetwork_ref(state_small, padded, action_size)
    assert q_small.shape == (batch_small, action_size)
    assert jnp.allclose(q_small, q_small_ref, atol=1e-2, rtol=1e-2)

    print("KERNEL_OK")
</pallas_src>

<mosaic_0001>
module attributes {stable_mosaic.version = 11 : i64} {
  func.func @qnetwork_kernel(%arg0: i32, %arg1: memref<512x16xbf16, #tpu.memory_space<vmem>>, %arg2: memref<16x128xbf16, #tpu.memory_space<vmem>>, %arg3: memref<1x128xf32, #tpu.memory_space<vmem>>, %arg4: memref<128x128xbf16, #tpu.memory_space<vmem>>, %arg5: memref<1x128xf32, #tpu.memory_space<vmem>>, %arg6: memref<128x128xbf16, #tpu.memory_space<vmem>>, %arg7: memref<1x128xf32, #tpu.memory_space<vmem>>, %arg8: memref<512x128xf32, #tpu.memory_space<vmem>>) attributes {dimension_semantics = [#tpu.dimension_semantics<parallel>], iteration_bounds = array<i64: 2>, scalar_prefetch = 0 : i64, scratch_operands = 0 : i64, tpu.core_type = #tpu.core_type<tc>, window_params = [{transform_indices = @transform_0, window_bounds = array<i64: 512, 16>}, {pipeline_mode = #tpu.pipeline_mode<synchronous>, transform_indices = @transform_1, window_bounds = array<i64: 16, 128>}, {pipeline_mode = #tpu.pipeline_mode<synchronous>, transform_indices = @transform_2, window_bounds = array<i64: 1, 128>}, {pipeline_mode = #tpu.pipeline_mode<synchronous>, transform_indices = @transform_3, window_bounds = array<i64: 128, 128>}, {pipeline_mode = #tpu.pipeline_mode<synchronous>, transform_indices = @transform_4, window_bounds = array<i64: 1, 128>}, {pipeline_mode = #tpu.pipeline_mode<synchronous>, transform_indices = @transform_5, window_bounds = array<i64: 128, 128>}, {pipeline_mode = #tpu.pipeline_mode<synchronous>, transform_indices = @transform_6, window_bounds = array<i64: 1, 128>}, {transform_indices = @transform_7, window_bounds = array<i64: 512, 128>}]} {
    %c0 = arith.constant 0 : index
    %c0_0 = arith.constant 0 : index
    %0 = vector.load %arg1[%c0, %c0_0] : memref<512x16xbf16, #tpu.memory_space<vmem>>, vector<512x16xbf16>
    %c0_1 = arith.constant 0 : index
    %c0_2 = arith.constant 0 : index
    %1 = vector.load %arg2[%c0_1, %c0_2] : memref<16x128xbf16, #tpu.memory_space<vmem>>, vector<16x128xbf16>
    %cst = arith.constant dense<0.000000e+00> : vector<512x128xf32>
    %2 = tpu.matmul %0, %1, %cst {dimension_numbers = #tpu.dot_dimension_numbers<[1], [0], [0], [1], [0, 0, 1, 1], [], []>} : vector<512x16xbf16>, vector<16x128xbf16>, vector<512x128xf32> -> vector<512x128xf32>
    %c0_3 = arith.constant 0 : index
    %c0_4 = arith.constant 0 : index
    %3 = vector.load %arg3[%c0_3, %c0_4] : memref<1x128xf32, #tpu.memory_space<vmem>>, vector<1x128xf32>
    %4 = vector.broadcast %3 : vector<1x128xf32> to vector<512x128xf32>
    %5 = arith.addf %2, %4 : vector<512x128xf32>
    %cst_5 = arith.constant 0.000000e+00 : f32
    %6 = vector.broadcast %cst_5 : f32 to vector<512x128xf32>
    %7 = arith.maximumf %5, %6 : vector<512x128xf32>
    %8 = arith.truncf %7 : vector<512x128xf32> to vector<512x128xbf16>
    %c0_6 = arith.constant 0 : index
    %c0_7 = arith.constant 0 : index
    %9 = vector.load %arg4[%c0_6, %c0_7] : memref<128x128xbf16, #tpu.memory_space<vmem>>, vector<128x128xbf16>
    %cst_8 = arith.constant dense<0.000000e+00> : vector<512x128xf32>
    %10 = tpu.matmul %8, %9, %cst_8 {dimension_numbers = #tpu.dot_dimension_numbers<[1], [0], [0], [1], [0, 0, 1, 1], [], []>} : vector<512x128xbf16>, vector<128x128xbf16>, vector<512x128xf32> -> vector<512x128xf32>
    %c0_9 = arith.constant 0 : index
    %c0_10 = arith.constant 0 : index
    %11 = vector.load %arg5[%c0_9, %c0_10] : memref<1x128xf32, #tpu.memory_space<vmem>>, vector<1x128xf32>
    %12 = vector.broadcast %11 : vector<1x128xf32> to vector<512x128xf32>
    %13 = arith.addf %10, %12 : vector<512x128xf32>
    %cst_11 = arith.constant 0.000000e+00 : f32
    %14 = vector.broadcast %cst_11 : f32 to vector<512x128xf32>
    %15 = arith.maximumf %13, %14 : vector<512x128xf32>
    %16 = arith.truncf %15 : vector<512x128xf32> to vector<512x128xbf16>
    %c0_12 = arith.constant 0 : index
    %c0_13 = arith.constant 0 : index
    %17 = vector.load %arg6[%c0_12, %c0_13] : memref<128x128xbf16, #tpu.memory_space<vmem>>, vector<128x128xbf16>
    %cst_14 = arith.constant dense<0.000000e+00> : vector<512x128xf32>
    %18 = tpu.matmul %16, %17, %cst_14 {dimension_numbers = #tpu.dot_dimension_numbers<[1], [0], [0], [1], [0, 0, 1, 1], [], []>} : vector<512x128xbf16>, vector<128x128xbf16>, vector<512x128xf32> -> vector<512x128xf32>
    %c0_15 = arith.constant 0 : index
    %c0_16 = arith.constant 0 : index
    %19 = vector.load %arg7[%c0_15, %c0_16] : memref<1x128xf32, #tpu.memory_space<vmem>>, vector<1x128xf32>
    %20 = vector.broadcast %19 : vector<1x128xf32> to vector<512x128xf32>
    %21 = arith.addf %18, %20 : vector<512x128xf32>
    %c0_17 = arith.constant 0 : index
    %c0_18 = arith.constant 0 : index
    %22 = vector.load %arg8[%c0_17, %c0_18] : memref<512x128xf32, #tpu.memory_space<vmem>>, vector<512x128xf32>
    tpu.vector_store %arg8[%c0_17, %c0_18], %21 {strides = array<i32>} : memref<512x128xf32, #tpu.memory_space<vmem>>, vector<512x128xf32>,
    return
  }
  func.func @transform_0(%arg0: i32) -> (i32, i32) {
    %c0_i32 = arith.constant 0 : i32
    %c0_i32_0 = arith.constant 0 : i32
    return %arg0, %c0_i32 : i32, i32
  }
  func.func @transform_1(%arg0: i32) -> (i32, i32) {
    %c0_i32 = arith.constant 0 : i32
    %c0_i32_0 = arith.constant 0 : i32
    %c0_i32_1 = arith.constant 0 : i32
    return %c0_i32, %c0_i32_0 : i32, i32
  }
  func.func @transform_2(%arg0: i32) -> (i32, i32) {
    %c0_i32 = arith.constant 0 : i32
    %c0_i32_0 = arith.constant 0 : i32
    %c0_i32_1 = arith.constant 0 : i32
    return %c0_i32, %c0_i32_0 : i32, i32
  }
  func.func @transform_3(%arg0: i32) -> (i32, i32) {
    %c0_i32 = arith.constant 0 : i32
    %c0_i32_0 = arith.constant 0 : i32
    %c0_i32_1 = arith.constant 0 : i32
    return %c0_i32, %c0_i32_0 : i32, i32
  }
  func.func @transform_4(%arg0: i32) -> (i32, i32) {
    %c0_i32 = arith.constant 0 : i32
    %c0_i32_0 = arith.constant 0 : i32
    %c0_i32_1 = arith.constant 0 : i32
    return %c0_i32, %c0_i32_0 : i32, i32
  }
  func.func @transform_5(%arg0: i32) -> (i32, i32) {
    %c0_i32 = arith.constant 0 : i32
    %c0_i32_0 = arith.constant 0 : i32
    %c0_i32_1 = arith.constant 0 : i32
    return %c0_i32, %c0_i32_0 : i32, i32
  }
  func.func @transform_6(%arg0: i32) -> (i32, i32) {
    %c0_i32 = arith.constant 0 : i32
    %c0_i32_0 = arith.constant 0 : i32
    %c0_i32_1 = arith.constant 0 : i32
    return %c0_i32, %c0_i32_0 : i32, i32
  }
  func.func @transform_7(%arg0: i32) -> (i32, i32) {
    %c0_i32 = arith.constant 0 : i32
    %c0_i32_0 = arith.constant 0 : i32
    return %arg0, %c0_i32 : i32, i32
  }
}

</mosaic_0001>

<bundles_post_ra>
// kernel: tpu_custom_call.1
= control target key start
LH: loop header
LB: loop body
LE: loop exit
PB: predicated region body
PF: predicated region fallthrough
CT: control target
= control target key end

     0   :  { %12 = vsyncpa [#allocation3], 0  ;;  %s3120_s0 = inlined_call_operand.vmem [shape: bf16[1024,16], index: 0, kind: input, shape index: {}]   ;;  %s3121_s1 = inlined_call_operand.vmem [shape: bf16[16,128], index: 1, kind: input, shape index: {}]   ;;  %s3122_s2 = inlined_call_operand.vmem [shape: f32[1,128], index: 2, kind: input, shape index: {}]   ;;  %s3123_s3 = inlined_call_operand.vmem [shape: bf16[128,128], index: 3, kind: input, shape index: {}]   ;;  %s3124_s4 = inlined_call_operand.vmem [shape: f32[1,128], index: 4, kind: input, shape index: {}]   ;;  %s3125_s5 = inlined_call_operand.vmem [shape: bf16[128,128], index: 5, kind: input, shape index: {}]   ;;  %s3126_s6 = inlined_call_operand.vmem [shape: f32[1,128], index: 6, kind: input, shape index: {}]   ;;  %s3127_s7 = inlined_call_operand.hbm [shape: f32[1024,128], index: 7, kind: output, shape index: {}]  }
   0x1   :  { %14 = vsyncpa [#allocation3 + $0x1], 0  ;;  %s2593_s24 = smov 0   ;;  %s2595_s25 = smov 0  }
   0x2   :  { %s2597_s26 = smov 0   ;;  %s2599_s27 = smov 0  }
   0x3 LB: > { %s2614_s28 = sadd.s32 4294967295, %s2548_s27   ;;  %s1958_s29 = sadd.s32 4294967294, %s2548_s27   ;;  %s2548_s27 = sphi %s2599_s27, %s3133_s27   ;;  %s2544_s26 = sphi %s2597_s26, %s3132_s26   ;;  %s2540_s25 = sphi %s2595_s25, %s3131_s25   ;;  %s2536_s24 = sphi %s2593_s24, %s3130_s24  }
   0x4   : > { %s2618_s30 = sadd.s32 1, %s2548_s27   ;;  %s179_s8 = sadd.s32 1, %s2544_s26 }
   0x5   : > { %s176_s9 = ssub.s32 %s2548_s27, %s2618_s30  ;;  %p189_p0 = scmp.ne.s32.totalorder %s2544_s26, %s2540_s25 }
   0x6   : > { %p177_p1 = scmp.eq.s32.totalorder %s176_s9, 0  ;;  %p190_p2 = scmp.eq.s32.totalorder %s2614_s28, 1 }
   0x7   : > { %p195_p3 = scmp.ne.s32.totalorder %s2540_s25, %s2536_s24  ;;  %p196_p4 = scmp.eq.s32.totalorder %s1958_s29, 1 }
   0x8   : > { %s2629_s10 = scalar_select %p177_p1, %s2544_s26, %s179_s8  }
   0x9   : > { %p2631_p5 = por %p190_p2, %p189_p0  ;;  %p2635_p6 = por %p196_p4, %p195_p3 }
   0xa   : > { %p1961_p7 = scmp.ge.s32.totalorder %s2548_s27, 1  ;;  %p241_p8 = scmp.lt.s32.totalorder %s2548_s27, 3 }
   0xc   : > { %p242_p9 = pnand %p1961_p7, %p241_p8 }
   0xd   : > { %v2437_v0 = vld [vmem:[%s3121_s1] sm:$0xff] (!%p242_p9)   ;;  %s1963_s15 = sshll.u32 (!%p242_p9), %s2614_s28, 6  ;;  %vm520_vm0 = vcmask (!%p242_p9), 130048   ;;  %v2471_v10 = vld [vmem:[%s3123_s3 + $0x8] sm:$0xff] (!%p242_p9)   ;;  %v2472_v13 = vld [vmem:[%s3123_s3 + $0x10] sm:$0xff] (!%p242_p9)   ;;  %s270_s14 = sand.u32 (!%p242_p9), 1, %s2540_s25  }
   0xe   : > { %245 = sbr.rel (%p242_p9) target bundleno = 822 (0x336), region = 48  ;;  %p274_p10 = scmp.lt.s32.totalorder (!%p242_p9), %s1963_s15, 127  ;;  %2168 = vmatprep.subr.bf16.mxu0 (!%p242_p9), %v2437_v0  ;;  %2394 = vmatprep.subr.bf16.mxu1 (!%p242_p9), %v2437_v0  ;;  %v2470_v1 = vld [vmem:[%s3123_s3] sm:$0xff] (!%p242_p9)   ;;  %v2473_v18 = vld [vmem:[%s3123_s3 + $0x18] sm:$0xff] (!%p242_p9)   ;;  %v2475_v24 = vld [vmem:[%s3123_s3 + $0x28] sm:$0xff] (!%p242_p9)  }
   0xf   : > { %2169 = vmatpush3.bf16.msra.mxu0 (!%p242_p9), %v2437_v0  ;;  %2395 = vmatpush3.bf16.msra.mxu1 (!%p242_p9), %v2437_v0  ;;  %v2474_v19 = vld [vmem:[%s3123_s3 + $0x20] sm:$0xff] (!%p242_p9)   ;;  %v2476_v25 = vld [vmem:[%s3123_s3 + $0x30] sm:$0xff] (!%p242_p9)   ;;  %v2477_v40 = vld [vmem:[%s3123_s3 + $0x38] sm:$0xff] (!%p242_p9)   ;;  %s2054_s19 = sshll.u32 (!%p242_p9), %s2614_s28, 13  ;;  %s3079_s28 = scalar_lea.sflag (!%p242_p9), [#allocation3], %s270_s14 }
  0x10   : > { %2234 = vmatprep.subr.bf16.mxu1 (!%p242_p9), %v2470_v1  ;;  %v2741_v41 = vld [vmem:[%s3122_s2] ss:$0 sm:$0xff] (!%p242_p9)  ;;  %v2479_v50 = vld [vmem:[%s3125_s5 + $0x8] sm:$0xff] (!%p242_p9)   ;;  %v2480_v57 = vld [vmem:[%s3125_s5 + $0x10] sm:$0xff] (!%p242_p9)   ;;  %s3069_s29 = scalar_lea.hbm (!%p242_p9), %s3127_s7, %s2054_s19  ;;  %s2550_s8 = smov (!%p242_p9), [#allocation2]  }
  0x11   : > { %v2478_v49 = vld [vmem:[%s3125_s5] sm:$0xff] (!%p242_p9)   ;;  %s2490_s9 = sshll.u32 (!%p242_p9), %s2550_s8, 4  ;;  %s2491_s9 = int_to_ptr.vmem [resolvable:$false] %s2490_s9 }
  0x12   : > { %2314 = vmatprep.subr.bf16.mxu0 (!%p242_p9), %v2478_v49  ;;  %s2492_s13 = scalar_lea.vmem (!%p242_p9), %s2491_s9, 16384 }
  0x15   : > { %s3135_s15 = smov (!%p274_p10, %s1963_s15), 127 }
  0x16   : > { %s1964_s18 = sshll.u32 %s3135_s15, 2  ;;  %s1962_s15 = sshll.u32 %s270_s14, 9 }
  0x17   : > { %s2651_s21 = scalar_lea.vmem %s3120_s0, %s1964_s18  ;;  %s2940_s18 = scalar_lea.vmem [#allocation2], %s1962_s15 }
  0x18   : > { %v2438_v2 = vld [vmem:[%s2651_s21] sm:$0xff]   ;;  %v2439_v3 = vld [vmem:[%s2651_s21 + $0x8] sm:$0xff]   ;;  %v2440_v4 = vld [vmem:[%s2651_s21 + $0x10] sm:$0xff]   ;;  %s1896_s20 = sshll.u32 %s2940_s18, 4  ;;  %s3071_s20 = int_to_ptr.vmem [resolvable:$true] %s1896_s20 }
  0x19   : > { %2170 = vmatprep.mubr.msk.bf16.mxu0 %vm520_vm0, %v2438_v2  ;;  %v2441_v5 = vld [vmem:[%s2651_s21 + $0x18] sm:$0xff]   ;;  %v2442_v6 = vld [vmem:[%s2651_s21 + $0x20] sm:$0xff]   ;;  %v2443_v7 = vld [vmem:[%s2651_s21 + $0x28] sm:$0xff]   ;;  %p2493_p0 = scmp.lt.s32.totalorder %s3071_s20, %s2491_s9 }
  0x1a   : > { %2171 = vmatmul.mubr.msk.bf16.vlgmr.msra.gmra.mrb[0].mxu0 %vm520_vm0, %v2439_v3  ;;  %v2444_v8 = vld [vmem:[%s2651_s21 + $0x30] sm:$0xff]   ;;  %v2454_v9 = vld [vmem:[%s2651_s21 + $0x80] sm:$0xff]   ;;  %v2455_v11 = vld [vmem:[%s2651_s21 + $0x88] sm:$0xff]  }
  0x1b   : > { %2174 = vmatprep.mubr.msk.bf16.mxu0 %vm520_vm0, %v2440_v4  ;;  %2202 = vmatprep.mubr.msk.bf16.mxu1 %vm520_vm0, %v2454_v9  ;;  %v2456_v12 = vld [vmem:[%s2651_s21 + $0x90] sm:$0xff]   ;;  %v2445_v14 = vld [vmem:[%s2651_s21 + $0x38] sm:$0xff]   ;;  %v2446_v15 = vld [vmem:[%s2651_s21 + $0x40] sm:$0xff]  }
  0x1c   : > { %2203 = vmatmul.mubr.msk.bf16.vlgmr.msra.gmra.mrb[0].mxu1 %vm520_vm0, %v2455_v11  ;;  %v2457_v16 = vld [vmem:[%s2651_s21 + $0x98] sm:$0xff]   ;;  %v2458_v17 = vld [vmem:[%s2651_s21 + $0xa0] sm:$0xff]   ;;  %v2447_v20 = vld [vmem:[%s2651_s21 + $0x48] sm:$0xff]   ;;  %2315 = vmatpush3.bf16.msra.mxu0 %v2478_v49 }
  0x1d   : > { %2206 = vmatprep.mubr.msk.bf16.mxu1 %vm520_vm0, %v2456_v12  ;;  %2235 = vmatpush3.bf16.msra.mxu1 %v2470_v1  ;;  %v2448_v21 = vld [vmem:[%s2651_s21 + $0x50] sm:$0xff]   ;;  %v2459_v22 = vld [vmem:[%s2651_s21 + $0xa8] sm:$0xff]   ;;  %v2449_v26 = vld [vmem:[%s2651_s21 + $0x58] sm:$0xff]  }
  0x1e   : > { %2236 = vmatprep.subr.bf16.mxu1 %v2471_v10  ;;  %v2460_v23 = vld [vmem:[%s2651_s21 + $0xb0] sm:$0xff]   ;;  %v2461_v27 = vld [vmem:[%s2651_s21 + $0xb8] sm:$0xff]   ;;  %v2450_v28 = vld [vmem:[%s2651_s21 + $0x60] sm:$0xff]   ;;  %2316 = vmatprep.subr.bf16.mxu0 %v2479_v50 }
  0x1f   : > { %v2462_v29 = vld [vmem:[%s2651_s21 + $0xc0] sm:$0xff]   ;;  %v2451_v30 = vld [vmem:[%s2651_s21 + $0x68] sm:$0xff]   ;;  %v2452_v32 = vld [vmem:[%s2651_s21 + $0x70] sm:$0xff]  }
  0x20   : > { %v2463_v31 = vld [vmem:[%s2651_s21 + $0xc8] sm:$0xff]   ;;  %v2464_v33 = vld [vmem:[%s2651_s21 + $0xd0] sm:$0xff]   ;;  %v2453_v34 = vld [vmem:[%s2651_s21 + $0x78] sm:$0xff]   ;;  %2317 = vmatpush3.bf16.msra.mxu0 %v2479_v50 }
  0x21   : > { %2237 = vmatpush3.bf16.msra.mxu1 %v2471_v10  ;;  %v2465_v35 = vld [vmem:[%s2651_s21 + $0xd8] sm:$0xff]   ;;  %v2466_v36 = vld [vmem:[%s2651_s21 + $0xe0] sm:$0xff]   ;;  %v2467_v37 = vld [vmem:[%s2651_s21 + $0xe8] sm:$0xff]   ;;  %2318 = vmatprep.subr.bf16.mxu0 %v2480_v57 }
  0x22   : > { %2175 = vmatmul.mubr.msk.bf16.gmra.mrb[4].mxu0 %vm520_vm0, %v2441_v5  ;;  %2238 = vmatprep.subr.bf16.mxu1 %v2472_v13  ;;  %v2468_v38 = vld [vmem:[%s2651_s21 + $0xf0] sm:$0xff]   ;;  %v2469_v39 = vld [vmem:[%s2651_s21 + $0xf8] sm:$0xff]   ;;  %v2482_v9 = vld [vmem:[%s3125_s5 + $0x20] sm:$0xff]   ;;  %s2486_s21 = scalar_lea.vmem %s3071_s20, 8192 }
  0x23   : > { %2178 = vmatprep.mubr.msk.bf16.mxu0 %vm520_vm0, %v2442_v6  ;;  %v2481_v2 = vld [vmem:[%s3125_s5 + $0x18] sm:$0xff]   ;;  %p2487_p11 = scmp.ne.s32.totalorder %s3071_s20, %s2486_s21  ;;  %p2494_p1 = scmp.lt.s32.totalorder %s2492_s13, %s2486_s21 }
  0x24   : > { %2207 = vmatmul.mubr.msk.bf16.gmra.mrb[4].mxu1 %vm520_vm0, %v2457_v16  ;;  %2319 = vmatpush3.bf16.msra.mxu0 %v2480_v57 }
  0x25   : > { %2210 = vmatprep.mubr.msk.bf16.mxu1 %vm520_vm0, %v2458_v17  ;;  %2239 = vmatpush3.bf16.msra.mxu1 %v2472_v13  ;;  %p2488_p12 = pnand %p2487_p11, %p2631_p5  ;;  %p2495_p2 = por %p2494_p1, %p2493_p0 }
  0x26   : > { %2240 = vmatprep.subr.bf16.mxu1 %v2473_v18  ;;  %2320 = vmatprep.subr.bf16.mxu0 %v2481_v2 }
  0x27   : > { %p2489_p13 = pneg %p2488_p12 }
  0x28   : > { %2321 = vmatpush3.bf16.msra.mxu0 %v2481_v2 }
  0x29   : > { %2241 = vmatpush3.bf16.msra.mxu1 %v2473_v18  ;;  %2322 = vmatprep.subr.bf16.mxu0 %v2482_v9  ;;  %p2496_p3 = pnand %p2495_p2, %p2489_p13 }
  0x2a   : > { %2179 = vmatmul.mubr.msk.bf16.gmra.mrb[8].mxu0 %vm520_vm0, %v2443_v7  ;;  %2242 = vmatprep.subr.bf16.mxu1 %v2474_v19 }
  0x2b   : > { %2182 = vmatprep.mubr.msk.bf16.mxu0 %vm520_vm0, %v2444_v8 }
  0x2c   : > { %2211 = vmatmul.mubr.msk.bf16.gmra.mrb[8].mxu1 %vm520_vm0, %v2459_v22  ;;  %2323 = vmatpush3.bf16.msra.mxu0 %v2482_v9 }
  0x2d   : > { %2214 = vmatprep.mubr.msk.bf16.mxu1 %vm520_vm0, %v2460_v23  ;;  %2243 = vmatpush3.bf16.msra.mxu1 %v2474_v19 }
  0x2e   : > { %2244 = vmatprep.subr.bf16.mxu1 %v2475_v24 }
  0x31   : > { %2245 = vmatpush3.bf16.msra.mxu1 %v2475_v24 }
  0x32   : > { %2183 = vmatmul.mubr.msk.bf16.gmra.mrb[12].mxu0 %vm520_vm0, %v2445_v14  ;;  %2246 = vmatprep.subr.bf16.mxu1 %v2476_v25 }
  0x33   : > { %2186 = vmatprep.mubr.msk.bf16.mxu0 %vm520_vm0, %v2446_v15 }
  0x34   : > { %2215 = vmatmul.mubr.msk.bf16.gmra.mrb[12].mxu1 %vm520_vm0, %v2461_v27 }
  0x35   : > { %2218 = vmatprep.mubr.msk.bf16.mxu1 %vm520_vm0, %v2462_v29  ;;  %2247 = vmatpush3.bf16.msra.mxu1 %v2476_v25 }
  0x36   : > { %2248 = vmatprep.subr.bf16.mxu1 %v2477_v40 }
  0x39   : > { %2249 = vmatpush3.bf16.msra.mxu1 %v2477_v40 }
  0x3a   : > { %2187 = vmatmul.mubr.msk.bf16.gmra.mrb[16].mxu0 %vm520_vm0, %v2447_v20 }
  0x3b   : > { %2190 = vmatprep.mubr.msk.bf16.mxu0 %vm520_vm0, %v2448_v21 }
  0x3c   : > { %2219 = vmatmul.mubr.msk.bf16.gmra.mrb[16].mxu1 %vm520_vm0, %v2463_v31 }
  0x3d   : > { %2222 = vmatprep.mubr.msk.bf16.mxu1 %vm520_vm0, %v2464_v33 }
  0x42   : > { %2191 = vmatmul.mubr.msk.bf16.gmra.mrb[20].mxu0 %vm520_vm0, %v2449_v26  ;;  %v2483_v26 = vld [vmem:[%s3125_s5 + $0x28] sm:$0xff]  }
  0x43   : > { %2194 = vmatprep.mubr.msk.bf16.mxu0 %vm520_vm0, %v2450_v28  ;;  %2324 = vmatprep.subr.bf16.mxu0 %v2483_v26 }
  0x44   : > { %2223 = vmatmul.mubr.msk.bf16.gmra.mrb[20].mxu1 %vm520_vm0, %v2465_v35  ;;  %2325 = vmatpush3.bf16.msra.mxu0 %v2483_v26 }
  0x45   : > { %2226 = vmatprep.mubr.msk.bf16.mxu1 %vm520_vm0, %v2466_v36 }
  0x4a   : > { %2195 = vmatmul.mubr.msk.bf16.gmra.mrb[24].mxu0 %vm520_vm0, %v2451_v30 }
  0x4b   : > { %2198 = vmatprep.mubr.msk.bf16.mxu0 %vm520_vm0, %v2452_v32 }
  0x4c   : > { %2227 = vmatmul.mubr.msk.bf16.gmra.mrb[24].mxu1 %vm520_vm0, %v2467_v37 }
  0x4d   : > { %2230 = vmatprep.mubr.msk.bf16.mxu1 %vm520_vm0, %v2468_v38  ;;  %v2484_v38 = vld [vmem:[%s3125_s5 + $0x30] sm:$0xff]  }
  0x4e   : > { %2326 = vmatprep.subr.bf16.mxu0 %v2484_v38 }
  0x4f   : > { %2327 = vmatpush3.bf16.msra.mxu0 %v2484_v38 }
  0x52   : > { %2199 = vmatmul.mubr.msk.bf16.gmra.mrb[28].mxu0 %vm520_vm0, %v2453_v34 }
  0x54   : > { %2231 = vmatmul.mubr.msk.bf16.gmra.mrb[28].mxu1 %vm520_vm0, %v2469_v39 }
  0xed   : > { %v2172_v42 = vpop.f32.mrb[0].mxu0 }
  0xee   : > { %v660_v43 = vadd.f32 %v2172_v42, %v2741_v41  ;;  %v651_v44 = vpop.f32.mrb[1].mxu0 }
  0xef   : > { %v652_v45 = vadd.f32 %v2741_v41, %v651_v44  ;;  %v2173_v46 = vpop.f32.mrb[2].mxu0  ;;  %v2204_v12 = vpop.f32.mrb[0].mxu1 }
  0xf0   : > { %v663_v47 = vadd.f32 %v2173_v46, %v2741_v41  ;;  %v654_v48 = vpop.f32.mrb[3].mxu0  ;;  %v908_v52 = vmax.f32 %v660_v43, 0.0  ;;  %v788_v15 = vadd.f32 %v2204_v12, %v2741_v41  ;;  %v779_v16 = vpop.f32.mrb[1].mxu1 }
  0xf1   : > { %v655_v51 = vadd.f32 %v2741_v41, %v654_v48  ;;  %v906_v54 = vmax.f32 %v652_v45, 0.0  ;;  %v780_v19 = vadd.f32 %v2741_v41, %v779_v16  ;;  %v2205_v20 = vpop.f32.mrb[2].mxu1 }
  0xf2   : > { %v909_v53 = vmax.f32 %v663_v47, 0.0  ;;  %v940_v23 = vmax.f32 %v788_v15, 0.0  ;;  %v791_v24 = vadd.f32 %v2205_v20, %v2741_v41  ;;  %v782_v25 = vpop.f32.mrb[3].mxu1 }
  0xf3   : > { %v907_v55 = vmax.f32 %v655_v51, 0.0  ;;  %v938_v28 = vmax.f32 %v780_v19, 0.0  ;;  %v783_v29 = vadd.f32 %v2741_v41, %v782_v25 }
  0xf4   : > { %v971_v56 = vpack.c.bf16 %v909_v53, %v908_v52  ;;  %v941_v32 = vmax.f32 %v791_v24, 0.0 }
  0xf5   : > { %v970_v58 = vpack.c.bf16 %v907_v55, %v906_v54  ;;  %v2176_v59 = vpop.f32.mrb[4].mxu0  ;;  %v939_v35 = vmax.f32 %v783_v29, 0.0 }
  0xf6   : > { %v676_v60 = vadd.f32 %v2176_v59, %v2741_v41  ;;  %v667_v61 = vpop.f32.mrb[5].mxu0  ;;  %v2777_v37 = vpack.c.bf16 %v941_v32, %v940_v23 }
  0xf7   : > { %v668_v62 = vadd.f32 %v2741_v41, %v667_v61  ;;  %v2177_v63 = vpop.f32.mrb[6].mxu0  ;;  %2250 = vmatprep.mubr.bf16.mxu1 %v970_v58  ;;  %v2782_v42 = vpack.c.bf16 %v939_v35, %v938_v28  ;;  %v2208_v43 = vpop.f32.mrb[4].mxu1 }
  0xf8   : > { %v679_v0 = vadd.f32 %v2177_v63, %v2741_v41  ;;  %v670_v1 = vpop.f32.mrb[7].mxu0  ;;  %2251 = vmatmul.mubr.bf16.vlgmr.msra.gmra.mrb[32].mxu1 %v971_v56  ;;  %v912_v4 = vmax.f32 %v676_v60, 0.0  ;;  %v804_v46 = vadd.f32 %v2208_v43, %v2741_v41  ;;  %v795_v47 = vpop.f32.mrb[5].mxu1 }
  0xf9   : > { %v671_v3 = vadd.f32 %v2741_v41, %v670_v1  ;;  %v910_v6 = vmax.f32 %v668_v62, 0.0  ;;  %v796_v50 = vadd.f32 %v2741_v41, %v795_v47  ;;  %v2209_v51 = vpop.f32.mrb[6].mxu1 }
  0xfa   : > { %v913_v5 = vmax.f32 %v679_v0, 0.0  ;;  %v944_v54 = vmax.f32 %v804_v46, 0.0  ;;  %v807_v55 = vadd.f32 %v2209_v51, %v2741_v41  ;;  %v798_v56 = vpop.f32.mrb[7].mxu1 }
  0xfb   : > { %v911_v7 = vmax.f32 %v671_v3, 0.0  ;;  %v942_v58 = vmax.f32 %v796_v50, 0.0  ;;  %v799_v59 = vadd.f32 %v2741_v41, %v798_v56 }
  0xfc   : > { %v973_v8 = vpack.c.bf16 %v913_v5, %v912_v4  ;;  %v945_v62 = vmax.f32 %v807_v55, 0.0 }
  0xfd   : > { %v972_v10 = vpack.c.bf16 %v911_v7, %v910_v6  ;;  %v2180_v11 = vpop.f32.mrb[8].mxu0  ;;  %v943_v1 = vmax.f32 %v799_v59, 0.0 }
  0xfe   : > { %v692_v13 = vadd.f32 %v2180_v11, %v2741_v41  ;;  %v683_v14 = vpop.f32.mrb[9].mxu0  ;;  %v2792_v3 = vpack.c.bf16 %v945_v62, %v944_v54 }
  0xff   : > { %v684_v17 = vadd.f32 %v2741_v41, %v683_v14  ;;  %v2181_v18 = vpop.f32.mrb[10].mxu0  ;;  %2254 = vmatprep.mubr.bf16.mxu1 %v972_v10  ;;  %v2794_v6 = vpack.c.bf16 %v943_v1, %v942_v58  ;;  %v2212_v7 = vpop.f32.mrb[8].mxu1 }
 0x100   : > { %v695_v21 = vadd.f32 %v2181_v18, %v2741_v41  ;;  %v686_v22 = vpop.f32.mrb[11].mxu0  ;;  %2255 = vmatmul.mubr.bf16.gmra.mrb[36].mxu1 %v973_v8  ;;  %v916_v30 = vmax.f32 %v692_v13, 0.0  ;;  %v820_v10 = vadd.f32 %v2212_v7, %v2741_v41  ;;  %v811_v11 = vpop.f32.mrb[9].mxu1 }
 0x101   : > { %v687_v27 = vadd.f32 %v2741_v41, %v686_v22  ;;  %v914_v33 = vmax.f32 %v684_v17, 0.0  ;;  %v812_v14 = vadd.f32 %v2741_v41, %v811_v11  ;;  %v2213_v15 = vpop.f32.mrb[10].mxu1 }
 0x102   : > { %v917_v31 = vmax.f32 %v695_v21, 0.0  ;;  %v948_v18 = vmax.f32 %v820_v10, 0.0  ;;  %v823_v19 = vadd.f32 %v2213_v15, %v2741_v41  ;;  %v814_v20 = vpop.f32.mrb[11].mxu1 }
 0x103   : > { %v915_v34 = vmax.f32 %v687_v27, 0.0  ;;  %v946_v22 = vmax.f32 %v812_v14, 0.0  ;;  %v815_v23 = vadd.f32 %v2741_v41, %v814_v20 }
 0x104   : > { %v975_v36 = vpack.c.bf16 %v917_v31, %v916_v30  ;;  %v949_v26 = vmax.f32 %v823_v19, 0.0 }
 0x105   : > { %v974_v39 = vpack.c.bf16 %v915_v34, %v914_v33  ;;  %v2184_v40 = vpop.f32.mrb[12].mxu0  ;;  %v947_v29 = vmax.f32 %v815_v23, 0.0 }
 0x106   : > { %v708_v44 = vadd.f32 %v2184_v40, %v2741_v41  ;;  %v699_v45 = vpop.f32.mrb[13].mxu0  ;;  %v2804_v31 = vpack.c.bf16 %v949_v26, %v948_v18 }
 0x107   : > { %v700_v48 = vadd.f32 %v2741_v41, %v699_v45  ;;  %v2185_v49 = vpop.f32.mrb[14].mxu0  ;;  %2258 = vmatprep.mubr.bf16.mxu1 %v974_v39  ;;  %v2806_v34 = vpack.c.bf16 %v947_v29, %v946_v22  ;;  %v2216_v35 = vpop.f32.mrb[12].mxu1 }
 0x108   : > { %v711_v52 = vadd.f32 %v2185_v49, %v2741_v41  ;;  %v702_v53 = vpop.f32.mrb[15].mxu0  ;;  %2259 = vmatmul.mubr.bf16.gmra.mrb[40].mxu1 %v975_v36  ;;  %v920_v60 = vmax.f32 %v708_v44, 0.0  ;;  %v836_v39 = vadd.f32 %v2216_v35, %v2741_v41  ;;  %v827_v40 = vpop.f32.mrb[13].mxu1 }
 0x109   : > { %v703_v57 = vadd.f32 %v2741_v41, %v702_v53  ;;  %v918_v63 = vmax.f32 %v700_v48, 0.0  ;;  %v828_v45 = vadd.f32 %v2741_v41, %v827_v40  ;;  %v2217_v46 = vpop.f32.mrb[14].mxu1 }
 0x10a   : > { %v921_v61 = vmax.f32 %v711_v52, 0.0  ;;  %v952_v49 = vmax.f32 %v836_v39, 0.0  ;;  %v839_v50 = vadd.f32 %v2217_v46, %v2741_v41  ;;  %v830_v51 = vpop.f32.mrb[15].mxu1 }
 0x10b   : > { %v919_v0 = vmax.f32 %v703_v57, 0.0  ;;  %v950_v53 = vmax.f32 %v828_v45, 0.0  ;;  %v831_v54 = vadd.f32 %v2741_v41, %v830_v51 }
 0x10c   : > { %v977_v2 = vpack.c.bf16 %v921_v61, %v920_v60  ;;  %v953_v57 = vmax.f32 %v839_v50, 0.0 }
 0x10d   : > { %v976_v4 = vpack.c.bf16 %v919_v0, %v918_v63  ;;  %v2188_v5 = vpop.f32.mrb[16].mxu0  ;;  %v951_v60 = vmax.f32 %v831_v54, 0.0 }
 0x10e   : > { %v724_v8 = vadd.f32 %v2188_v5, %v2741_v41  ;;  %v715_v9 = vpop.f32.mrb[17].mxu0  ;;  %v2816_v62 = vpack.c.bf16 %v953_v57, %v952_v49 }
 0x10f   : > { %v716_v12 = vadd.f32 %v2741_v41, %v715_v9  ;;  %v2189_v13 = vpop.f32.mrb[18].mxu0  ;;  %2262 = vmatprep.mubr.bf16.mxu1 %v976_v4  ;;  %v2818_v1 = vpack.c.bf16 %v951_v60, %v950_v53 }
 0x110   : > { %v727_v16 = vadd.f32 %v2189_v13, %v2741_v41  ;;  %v718_v17 = vpop.f32.mrb[19].mxu0  ;;  %2263 = vmatmul.mubr.bf16.gmra.mrb[44].mxu1 %v977_v2  ;;  %v924_v24 = vmax.f32 %v724_v8, 0.0  ;;  %v2220_v2 = vpop.f32.mrb[16].mxu1 }
 0x111   : > { %v719_v21 = vadd.f32 %v2741_v41, %v718_v17  ;;  %v922_v27 = vmax.f32 %v716_v12, 0.0  ;;  %v852_v7 = vadd.f32 %v2220_v2, %v2741_v41  ;;  %v843_v8 = vpop.f32.mrb[17].mxu1 }
 0x112   : > { %v925_v25 = vmax.f32 %v727_v16, 0.0  ;;  %v844_v11 = vadd.f32 %v2741_v41, %v843_v8  ;;  %v2221_v12 = vpop.f32.mrb[18].mxu1 }
 0x113   : > { %v923_v28 = vmax.f32 %v719_v21, 0.0  ;;  %v956_v15 = vmax.f32 %v852_v7, 0.0  ;;  %v855_v16 = vadd.f32 %v2221_v12, %v2741_v41  ;;  %v846_v17 = vpop.f32.mrb[19].mxu1 }
 0x114   : > { %v979_v30 = vpack.c.bf16 %v925_v25, %v924_v24  ;;  %v954_v19 = vmax.f32 %v844_v11, 0.0  ;;  %v847_v20 = vadd.f32 %v2741_v41, %v846_v17 }
 0x115   : > { %v978_v32 = vpack.c.bf16 %v923_v28, %v922_v27  ;;  %v2192_v33 = vpop.f32.mrb[20].mxu0  ;;  %v957_v23 = vmax.f32 %v855_v16, 0.0 }
 0x116   : > { %v740_v36 = vadd.f32 %v2192_v33, %v2741_v41  ;;  %v731_v38 = vpop.f32.mrb[21].mxu0  ;;  %v955_v26 = vmax.f32 %v847_v20, 0.0 }
 0x117   : > { %v732_v43 = vadd.f32 %v2741_v41, %v731_v38  ;;  %v2193_v44 = vpop.f32.mrb[22].mxu0  ;;  %2266 = vmatprep.mubr.bf16.mxu1 %v978_v32  ;;  %v2828_v28 = vpack.c.bf16 %v957_v23, %v956_v15  ;;  %v2224_v33 = vpop.f32.mrb[20].mxu1 }
 0x118   : > { %v743_v47 = vadd.f32 %v2193_v44, %v2741_v41  ;;  %v734_v48 = vpop.f32.mrb[23].mxu0  ;;  %2267 = vmatmul.mubr.bf16.gmra.mrb[48].mxu1 %v979_v30  ;;  %v928_v55 = vmax.f32 %v740_v36, 0.0  ;;  %v2830_v32 = vpack.c.bf16 %v955_v26, %v954_v19  ;;  %v868_v38 = vadd.f32 %v2224_v33, %v2741_v41  ;;  %v859_v39 = vpop.f32.mrb[21].mxu1 }
 0x119   : > { %v735_v52 = vadd.f32 %v2741_v41, %v734_v48  ;;  %v926_v58 = vmax.f32 %v732_v43, 0.0  ;;  %v860_v44 = vadd.f32 %v2741_v41, %v859_v39  ;;  %v2225_v45 = vpop.f32.mrb[22].mxu1 }
 0x11a   : > { %v929_v56 = vmax.f32 %v743_v47, 0.0  ;;  %v960_v48 = vmax.f32 %v868_v38, 0.0  ;;  %v871_v49 = vadd.f32 %v2225_v45, %v2741_v41  ;;  %v862_v50 = vpop.f32.mrb[23].mxu1 }
 0x11b   : > { %v927_v59 = vmax.f32 %v735_v52, 0.0  ;;  %v958_v52 = vmax.f32 %v860_v44, 0.0  ;;  %v863_v53 = vadd.f32 %v2741_v41, %v862_v50 }
 0x11c   : > { %v981_v61 = vpack.c.bf16 %v929_v56, %v928_v55  ;;  %v961_v56 = vmax.f32 %v871_v49, 0.0 }
 0x11d   : > { %v980_v63 = vpack.c.bf16 %v927_v59, %v926_v58  ;;  %v2196_v0 = vpop.f32.mrb[24].mxu0  ;;  %v959_v59 = vmax.f32 %v863_v53, 0.0 }
 0x11e   : > { %v756_v4 = vadd.f32 %v2196_v0, %v2741_v41  ;;  %v747_v5 = vpop.f32.mrb[25].mxu0 }
 0x11f   : > { %v748_v9 = vadd.f32 %v2741_v41, %v747_v5  ;;  %v2197_v10 = vpop.f32.mrb[26].mxu0  ;;  %2270 = vmatprep.mubr.bf16.mxu1 %v980_v63  ;;  %v996_v0 = vpack.c.bf16 %v959_v59, %v958_v52  ;;  %v2228_v2 = vpop.f32.mrb[24].mxu1 }
 0x120   : > { %v759_v13 = vadd.f32 %v2197_v10, %v2741_v41  ;;  %v750_v14 = vpop.f32.mrb[27].mxu0  ;;  %2271 = vmatmul.mubr.bf16.gmra.mrb[52].mxu1 %v981_v61  ;;  %v932_v21 = vmax.f32 %v756_v4, 0.0  ;;  %v997_v61 = vpack.c.bf16 %v961_v56, %v960_v48  ;;  %v884_v4 = vadd.f32 %v2228_v2, %v2741_v41  ;;  %v875_v5 = vpop.f32.mrb[25].mxu1 }
 0x121   : > { %v751_v18 = vadd.f32 %v2741_v41, %v750_v14  ;;  %v930_v24 = vmax.f32 %v748_v9, 0.0  ;;  %v876_v7 = vadd.f32 %v2741_v41, %v875_v5  ;;  %v2229_v8 = vpop.f32.mrb[26].mxu1 }
 0x122   : > { %v933_v22 = vmax.f32 %v759_v13, 0.0  ;;  %v964_v9 = vmax.f32 %v884_v4, 0.0  ;;  %v887_v10 = vadd.f32 %v2229_v8, %v2741_v41  ;;  %v878_v11 = vpop.f32.mrb[27].mxu1 }
 0x123   : > { %v931_v25 = vmax.f32 %v751_v18, 0.0  ;;  %v962_v12 = vmax.f32 %v876_v7, 0.0  ;;  %v879_v13 = vadd.f32 %v2741_v41, %v878_v11 }
 0x124   : > { %v983_v27 = vpack.c.bf16 %v933_v22, %v932_v21  ;;  %v965_v14 = vmax.f32 %v887_v10, 0.0 }
 0x125   : > { %v982_v29 = vpack.c.bf16 %v931_v25, %v930_v24  ;;  %v2200_v30 = vpop.f32.mrb[28].mxu0  ;;  %v963_v15 = vmax.f32 %v879_v13, 0.0 }
 0x126   : > { %v772_v35 = vadd.f32 %v2200_v30, %v2741_v41  ;;  %v763_v36 = vpop.f32.mrb[29].mxu0  ;;  %v999_v16 = vpack.c.bf16 %v965_v14, %v964_v9 }
 0x127   : > { %v764_v40 = vadd.f32 %v2741_v41, %v763_v36  ;;  %v2201_v43 = vpop.f32.mrb[30].mxu0  ;;  %2274 = vmatprep.mubr.bf16.mxu1 %v982_v29  ;;  %v998_v17 = vpack.c.bf16 %v963_v15, %v962_v12  ;;  %v2232_v18 = vpop.f32.mrb[28].mxu1 }
 0x128   : > { %v775_v46 = vadd.f32 %v2201_v43, %v2741_v41  ;;  %v766_v47 = vpop.f32.mrb[31].mxu0  ;;  %2275 = vmatmul.mubr.bf16.gmra.mrb[56].mxu1 %v983_v27  ;;  %v936_v54 = vmax.f32 %v772_v35, 0.0  ;;  %v900_v19 = vadd.f32 %v2232_v18, %v2741_v41  ;;  %v891_v20 = vpop.f32.mrb[29].mxu1 }
 0x129   : > { %v767_v51 = vadd.f32 %v2741_v41, %v766_v47  ;;  %v934_v57 = vmax.f32 %v764_v40, 0.0  ;;  %v892_v21 = vadd.f32 %v2741_v41, %v891_v20  ;;  %v2233_v22 = vpop.f32.mrb[30].mxu1 }
 0x12a   : > { %v937_v55 = vmax.f32 %v775_v46, 0.0  ;;  %v968_v23 = vmax.f32 %v900_v19, 0.0  ;;  %v903_v24 = vadd.f32 %v2233_v22, %v2741_v41 }
 0x12b   : > { %v935_v58 = vmax.f32 %v767_v51, 0.0  ;;  %v966_v25 = vmax.f32 %v892_v21, 0.0 }
 0x12c   : > { %v985_v60 = vpack.c.bf16 %v937_v55, %v936_v54  ;;  %v969_v27 = vmax.f32 %v903_v24, 0.0 }
 0x12d   : > { %v984_v63 = vpack.c.bf16 %v935_v58, %v934_v57 }
 0x12e   : > { %v1001_v30 = vpack.c.bf16 %v969_v27, %v968_v23 }
 0x12f   : > { %2278 = vmatprep.mubr.bf16.mxu1 %v984_v63 }
 0x130   : > { %2279 = vmatmul.mubr.bf16.gmra.mrb[60].mxu1 %v985_v60 }
 0x131   : > { %2282 = vmatprep.mubr.bf16.mxu1 %v2782_v42  ;;  %v894_v42 = vpop.f32.mrb[31].mxu1 }
 0x132   : > { %v895_v26 = vadd.f32 %v2741_v41, %v894_v42  ;;  %v2864_v41 = vld [vmem:[%s3124_s4] ss:$0 sm:$0xff] }
 0x134   : > { %v967_v29 = vmax.f32 %v895_v26, 0.0 }
 0x136   : > { %v1000_v33 = vpack.c.bf16 %v967_v29, %v966_v25 }
 0x138   : > { %2283 = vmatmul.mubr.bf16.gmra.mrb[64].mxu1 %v2777_v37  ;;  %v2485_v37 = vld [vmem:[%s3125_s5 + $0x38] sm:$0xff]  }
 0x139   : > { %2286 = vmatprep.mubr.bf16.mxu1 %v2794_v6  ;;  %2328 = vmatprep.subr.bf16.mxu0 %v2485_v37 }
 0x13a   : > { %2329 = vmatpush3.bf16.msra.mxu0 %v2485_v37 }
 0x140   : > { %2287 = vmatmul.mubr.bf16.gmra.mrb[68].mxu1 %v2792_v3 }
 0x141   : > { %2290 = vmatprep.mubr.bf16.mxu1 %v2806_v34 }
 0x148   : > { %2291 = vmatmul.mubr.bf16.gmra.mrb[72].mxu1 %v2804_v31 }
 0x149   : > { %2294 = vmatprep.mubr.bf16.mxu1 %v2818_v1 }
 0x150   : > { %2295 = vmatmul.mubr.bf16.gmra.mrb[76].mxu1 %v2816_v62 }
 0x151   : > { %2298 = vmatprep.mubr.bf16.mxu1 %v2830_v32 }
 0x158   : > { %2299 = vmatmul.mubr.bf16.gmra.mrb[80].mxu1 %v2828_v28 }
 0x159   : > { %2302 = vmatprep.mubr.bf16.mxu1 %v996_v0 }
 0x160   : > { %2303 = vmatmul.mubr.bf16.gmra.mrb[84].mxu1 %v997_v61 }
 0x161   : > { %2306 = vmatprep.mubr.bf16.mxu1 %v998_v17 }
 0x168   : > { %2307 = vmatmul.mubr.bf16.gmra.mrb[88].mxu1 %v999_v16 }
 0x169   : > { %2310 = vmatprep.mubr.bf16.mxu1 %v1000_v33 }
 0x170   : > { %2311 = vmatmul.mubr.bf16.gmra.mrb[92].mxu1 %v1001_v30 }
 0x1cb   : > { %v2252_v3 = vpop.f32.mrb[32].mxu1 }
 0x1cc   : > { %v1116_v6 = vadd.f32 %v2252_v3, %v2864_v41  ;;  %v1107_v31 = vpop.f32.mrb[33].mxu1 }
 0x1cd   : > { %v1108_v34 = vadd.f32 %v2864_v41, %v1107_v31  ;;  %v2253_v62 = vpop.f32.mrb[34].mxu1 }
 0x1ce   : > { %v1119_v1 = vadd.f32 %v2253_v62, %v2864_v41  ;;  %v1110_v28 = vpop.f32.mrb[35].mxu1  ;;  %v1364_v35 = vmax.f32 %v1116_v6, 0.0 }
 0x1cf   : > { %v1111_v32 = vadd.f32 %v2864_v41, %v1110_v28  ;;  %v1362_v38 = vmax.f32 %v1108_v34, 0.0 }
 0x1d0   : > { %v1365_v36 = vmax.f32 %v1119_v1, 0.0 }
 0x1d1   : > { %v1363_v39 = vmax.f32 %v1111_v32, 0.0 }
 0x1d2   : > { %v1427_v40 = vpack.c.bf16 %v1365_v36, %v1364_v35 }
 0x1d3   : > { %v1426_v43 = vpack.c.bf16 %v1363_v39, %v1362_v38  ;;  %v2256_v44 = vpop.f32.mrb[36].mxu1 }
 0x1d4   : > { %v1132_v45 = vadd.f32 %v2256_v44, %v2864_v41  ;;  %v1123_v46 = vpop.f32.mrb[37].mxu1 }
 0x1d5   : > { %v1124_v47 = vadd.f32 %v2864_v41, %v1123_v46  ;;  %v2257_v48 = vpop.f32.mrb[38].mxu1  ;;  %2330 = vmatprep.mubr.bf16.mxu0 %v1426_v43 }
 0x1d6   : > { %v1135_v49 = vadd.f32 %v2257_v48, %v2864_v41  ;;  %v1126_v50 = vpop.f32.mrb[39].mxu1  ;;  %2331 = vmatmul.mubr.bf16.vlgmr.msra.gmra.mrb[32].mxu0 %v1427_v40  ;;  %v1368_v52 = vmax.f32 %v1132_v45, 0.0 }
 0x1d7   : > { %v1127_v51 = vadd.f32 %v2864_v41, %v1126_v50  ;;  %v1366_v54 = vmax.f32 %v1124_v47, 0.0 }
 0x1d8   : > { %v1369_v53 = vmax.f32 %v1135_v49, 0.0 }
 0x1d9   : > { %v1367_v55 = vmax.f32 %v1127_v51, 0.0 }
 0x1da   : > { %v1429_v56 = vpack.c.bf16 %v1369_v53, %v1368_v52 }
 0x1db   : > { %v1428_v57 = vpack.c.bf16 %v1367_v55, %v1366_v54  ;;  %v2260_v58 = vpop.f32.mrb[40].mxu1 }
 0x1dc   : > { %v1148_v59 = vadd.f32 %v2260_v58, %v2864_v41  ;;  %v1139_v60 = vpop.f32.mrb[41].mxu1 }
 0x1dd   : > { %v1140_v61 = vadd.f32 %v2864_v41, %v1139_v60  ;;  %v2261_v63 = vpop.f32.mrb[42].mxu1  ;;  %2334 = vmatprep.mubr.bf16.mxu0 %v1428_v57 }
 0x1de   : > { %v1151_v0 = vadd.f32 %v2261_v63, %v2864_v41  ;;  %v1142_v2 = vpop.f32.mrb[43].mxu1  ;;  %2335 = vmatmul.mubr.bf16.gmra.mrb[36].mxu0 %v1429_v56  ;;  %v1372_v5 = vmax.f32 %v1148_v59, 0.0 }
 0x1df   : > { %v1143_v4 = vadd.f32 %v2864_v41, %v1142_v2  ;;  %v1370_v8 = vmax.f32 %v1140_v61, 0.0 }
 0x1e0   : > { %v1373_v7 = vmax.f32 %v1151_v0, 0.0 }
 0x1e1   : > { %v1371_v9 = vmax.f32 %v1143_v4, 0.0 }
 0x1e2   : > { %v1431_v10 = vpack.c.bf16 %v1373_v7, %v1372_v5 }
 0x1e3   : > { %v1430_v11 = vpack.c.bf16 %v1371_v9, %v1370_v8  ;;  %v2264_v12 = vpop.f32.mrb[44].mxu1 }
 0x1e4   : > { %v1164_v13 = vadd.f32 %v2264_v12, %v2864_v41  ;;  %v1155_v14 = vpop.f32.mrb[45].mxu1 }
 0x1e5   : > { %v1156_v15 = vadd.f32 %v2864_v41, %v1155_v14  ;;  %v2265_v16 = vpop.f32.mrb[46].mxu1  ;;  %2338 = vmatprep.mubr.bf16.mxu0 %v1430_v11 }
 0x1e6   : > { %v1167_v17 = vadd.f32 %v2265_v16, %v2864_v41  ;;  %v1158_v18 = vpop.f32.mrb[47].mxu1  ;;  %2339 = vmatmul.mubr.bf16.gmra.mrb[40].mxu0 %v1431_v10  ;;  %v1376_v20 = vmax.f32 %v1164_v13, 0.0 }
 0x1e7   : > { %v1159_v19 = vadd.f32 %v2864_v41, %v1158_v18  ;;  %v1374_v22 = vmax.f32 %v1156_v15, 0.0 }
 0x1e8   : > { %v1377_v21 = vmax.f32 %v1167_v17, 0.0 }
 0x1e9   : > { %v1375_v23 = vmax.f32 %v1159_v19, 0.0 }
 0x1ea   : > { %v1433_v24 = vpack.c.bf16 %v1377_v21, %v1376_v20 }
 0x1eb   : > { %v1432_v42 = vpack.c.bf16 %v1375_v23, %v1374_v22  ;;  %v2268_v25 = vpop.f32.mrb[48].mxu1 }
 0x1ec   : > { %v1180_v26 = vadd.f32 %v2268_v25, %v2864_v41  ;;  %v1171_v27 = vpop.f32.mrb[49].mxu1 }
 0x1ed   : > { %v1172_v29 = vadd.f32 %v2864_v41, %v1171_v27  ;;  %v2269_v30 = vpop.f32.mrb[50].mxu1  ;;  %2342 = vmatprep.mubr.bf16.mxu0 %v1432_v42 }
 0x1ee   : > { %v1183_v33 = vadd.f32 %v2269_v30, %v2864_v41  ;;  %v1174_v37 = vpop.f32.mrb[51].mxu1  ;;  %2343 = vmatmul.mubr.bf16.gmra.mrb[44].mxu0 %v1433_v24  ;;  %v1380_v6 = vmax.f32 %v1180_v26, 0.0 }
 0x1ef   : > { %v1175_v3 = vadd.f32 %v2864_v41, %v1174_v37  ;;  %v1378_v34 = vmax.f32 %v1172_v29, 0.0 }
 0x1f0   : > { %v1381_v31 = vmax.f32 %v1183_v33, 0.0 }
 0x1f1   : > { %v1379_v62 = vmax.f32 %v1175_v3, 0.0 }
 0x1f2   : > { %v1435_v1 = vpack.c.bf16 %v1381_v31, %v1380_v6 }
 0x1f3   : > { %v1434_v28 = vpack.c.bf16 %v1379_v62, %v1378_v34  ;;  %v2272_v32 = vpop.f32.mrb[52].mxu1 }
 0x1f4   : > { %v1196_v35 = vadd.f32 %v2272_v32, %v2864_v41  ;;  %v1187_v36 = vpop.f32.mrb[53].mxu1 }
 0x1f5   : > { %v1188_v38 = vadd.f32 %v2864_v41, %v1187_v36  ;;  %v2273_v39 = vpop.f32.mrb[54].mxu1  ;;  %2346 = vmatprep.mubr.bf16.mxu0 %v1434_v28 }
 0x1f6   : > { %v1199_v40 = vadd.f32 %v2273_v39, %v2864_v41  ;;  %v1190_v43 = vpop.f32.mrb[55].mxu1  ;;  %2347 = vmatmul.mubr.bf16.gmra.mrb[48].mxu0 %v1435_v1  ;;  %v1384_v45 = vmax.f32 %v1196_v35, 0.0 }
 0x1f7   : > { %v1191_v44 = vadd.f32 %v2864_v41, %v1190_v43  ;;  %v1382_v47 = vmax.f32 %v1188_v38, 0.0 }
 0x1f8   : > { %v1385_v46 = vmax.f32 %v1199_v40, 0.0 }
 0x1f9   : > { %v1383_v48 = vmax.f32 %v1191_v44, 0.0 }
 0x1fa   : > { %v1437_v49 = vpack.c.bf16 %v1385_v46, %v1384_v45 }
 0x1fb   : > { %v1436_v50 = vpack.c.bf16 %v1383_v48, %v1382_v47  ;;  %v2276_v51 = vpop.f32.mrb[56].mxu1 }
 0x1fc   : > { %v1212_v52 = vadd.f32 %v2276_v51, %v2864_v41  ;;  %v1203_v53 = vpop.f32.mrb[57].mxu1 }
 0x1fd   : > { %v1204_v54 = vadd.f32 %v2864_v41, %v1203_v53  ;;  %v2277_v55 = vpop.f32.mrb[58].mxu1  ;;  %2350 = vmatprep.mubr.bf16.mxu0 %v1436_v50 }
 0x1fe   : > { %v1215_v56 = vadd.f32 %v2277_v55, %v2864_v41  ;;  %v1206_v57 = vpop.f32.mrb[59].mxu1  ;;  %2351 = vmatmul.mubr.bf16.gmra.mrb[52].mxu0 %v1437_v49  ;;  %v1388_v59 = vmax.f32 %v1212_v52, 0.0 }
 0x1ff   : > { %v1207_v58 = vadd.f32 %v2864_v41, %v1206_v57  ;;  %v1386_v61 = vmax.f32 %v1204_v54, 0.0 }
 0x200   : > { %v1389_v60 = vmax.f32 %v1215_v56, 0.0 }
 0x201   : > { %v1387_v63 = vmax.f32 %v1207_v58, 0.0 }
 0x202   : > { %v1439_v0 = vpack.c.bf16 %v1389_v60, %v1388_v59 }
 0x203   : > { %v1438_v2 = vpack.c.bf16 %v1387_v63, %v1386_v61  ;;  %v2280_v4 = vpop.f32.mrb[60].mxu1 }
 0x204   : > { %v1228_v5 = vadd.f32 %v2280_v4, %v2864_v41  ;;  %v1219_v7 = vpop.f32.mrb[61].mxu1 }
 0x205   : > { %v1220_v8 = vadd.f32 %v2864_v41, %v1219_v7  ;;  %v2281_v9 = vpop.f32.mrb[62].mxu1  ;;  %2354 = vmatprep.mubr.bf16.mxu0 %v1438_v2 }
 0x206   : > { %v1231_v10 = vadd.f32 %v2281_v9, %v2864_v41  ;;  %v1222_v11 = vpop.f32.mrb[63].mxu1  ;;  %2355 = vmatmul.mubr.bf16.gmra.mrb[56].mxu0 %v1439_v0  ;;  %v1392_v13 = vmax.f32 %v1228_v5, 0.0 }
 0x207   : > { %v1223_v12 = vadd.f32 %v2864_v41, %v1222_v11  ;;  %v1390_v15 = vmax.f32 %v1220_v8, 0.0 }
 0x208   : > { %v1393_v14 = vmax.f32 %v1231_v10, 0.0 }
 0x209   : > { %v1391_v16 = vmax.f32 %v1223_v12, 0.0 }
 0x20a   : > { %v1441_v17 = vpack.c.bf16 %v1393_v14, %v1392_v13 }
 0x20b   : > { %v1440_v18 = vpack.c.bf16 %v1391_v16, %v1390_v15  ;;  %v2284_v19 = vpop.f32.mrb[64].mxu1 }
 0x20c   : > { %v1244_v20 = vadd.f32 %v2284_v19, %v2864_v41  ;;  %v1235_v21 = vpop.f32.mrb[65].mxu1 }
 0x20d   : > { %v1236_v22 = vadd.f32 %v2864_v41, %v1235_v21  ;;  %v2285_v23 = vpop.f32.mrb[66].mxu1  ;;  %2358 = vmatprep.mubr.bf16.mxu0 %v1440_v18 }
 0x20e   : > { %v1247_v24 = vadd.f32 %v2285_v23, %v2864_v41  ;;  %v1238_v42 = vpop.f32.mrb[67].mxu1  ;;  %2359 = vmatmul.mubr.bf16.gmra.mrb[60].mxu0 %v1441_v17  ;;  %v1396_v26 = vmax.f32 %v1244_v20, 0.0 }
 0x20f   : > { %v1239_v25 = vadd.f32 %v2864_v41, %v1238_v42  ;;  %v1394_v29 = vmax.f32 %v1236_v22, 0.0 }
 0x210   : > { %v1397_v27 = vmax.f32 %v1247_v24, 0.0 }
 0x211   : > { %v1395_v30 = vmax.f32 %v1239_v25, 0.0 }
 0x212   : > { %v1443_v33 = vpack.c.bf16 %v1397_v27, %v1396_v26 }
 0x213   : > { %v1442_v37 = vpack.c.bf16 %v1395_v30, %v1394_v29  ;;  %v2288_v3 = vpop.f32.mrb[68].mxu1 }
 0x214   : > { %v1260_v6 = vadd.f32 %v2288_v3, %v2864_v41  ;;  %v1251_v31 = vpop.f32.mrb[69].mxu1 }
 0x215   : > { %v1252_v34 = vadd.f32 %v2864_v41, %v1251_v31  ;;  %v2289_v62 = vpop.f32.mrb[70].mxu1  ;;  %2362 = vmatprep.mubr.bf16.mxu0 %v1442_v37 }
 0x216   : > { %v1263_v1 = vadd.f32 %v2289_v62, %v2864_v41  ;;  %v1254_v28 = vpop.f32.mrb[71].mxu1  ;;  %2363 = vmatmul.mubr.bf16.gmra.mrb[64].mxu0 %v1443_v33  ;;  %v1400_v35 = vmax.f32 %v1260_v6, 0.0 }
 0x217   : > { %v1255_v32 = vadd.f32 %v2864_v41, %v1254_v28  ;;  %v1398_v38 = vmax.f32 %v1252_v34, 0.0 }
 0x218   : > { %v1401_v36 = vmax.f32 %v1263_v1, 0.0 }
 0x219   : > { %v1399_v39 = vmax.f32 %v1255_v32, 0.0 }
 0x21a   : > { %v1445_v40 = vpack.c.bf16 %v1401_v36, %v1400_v35 }
 0x21b   : > { %v1444_v43 = vpack.c.bf16 %v1399_v39, %v1398_v38  ;;  %v2292_v44 = vpop.f32.mrb[72].mxu1 }
 0x21c   : > { %v1276_v45 = vadd.f32 %v2292_v44, %v2864_v41  ;;  %v1267_v46 = vpop.f32.mrb[73].mxu1 }
 0x21d   : > { %v1268_v47 = vadd.f32 %v2864_v41, %v1267_v46  ;;  %v2293_v48 = vpop.f32.mrb[74].mxu1  ;;  %2366 = vmatprep.mubr.bf16.mxu0 %v1444_v43 }
 0x21e   : > { %v1279_v49 = vadd.f32 %v2293_v48, %v2864_v41  ;;  %v1270_v50 = vpop.f32.mrb[75].mxu1  ;;  %2367 = vmatmul.mubr.bf16.gmra.mrb[68].mxu0 %v1445_v40  ;;  %v1404_v52 = vmax.f32 %v1276_v45, 0.0 }
 0x21f   : > { %v1271_v51 = vadd.f32 %v2864_v41, %v1270_v50  ;;  %v1402_v54 = vmax.f32 %v1268_v47, 0.0 }
 0x220   : > { %v1405_v53 = vmax.f32 %v1279_v49, 0.0 }
 0x221   : > { %v1403_v55 = vmax.f32 %v1271_v51, 0.0 }
 0x222   : > { %v1447_v56 = vpack.c.bf16 %v1405_v53, %v1404_v52 }
 0x223   : > { %v1446_v57 = vpack.c.bf16 %v1403_v55, %v1402_v54  ;;  %v2296_v58 = vpop.f32.mrb[76].mxu1 }
 0x224   : > { %v1292_v59 = vadd.f32 %v2296_v58, %v2864_v41  ;;  %v1283_v60 = vpop.f32.mrb[77].mxu1 }
 0x225   : > { %v1284_v61 = vadd.f32 %v2864_v41, %v1283_v60  ;;  %v2297_v63 = vpop.f32.mrb[78].mxu1  ;;  %2370 = vmatprep.mubr.bf16.mxu0 %v1446_v57 }
 0x226   : > { %v1295_v0 = vadd.f32 %v2297_v63, %v2864_v41  ;;  %v1286_v2 = vpop.f32.mrb[79].mxu1  ;;  %2371 = vmatmul.mubr.bf16.gmra.mrb[72].mxu0 %v1447_v56  ;;  %v1408_v5 = vmax.f32 %v1292_v59, 0.0 }
 0x227   : > { %v1287_v4 = vadd.f32 %v2864_v41, %v1286_v2  ;;  %v1406_v8 = vmax.f32 %v1284_v61, 0.0 }
 0x228   : > { %v1409_v7 = vmax.f32 %v1295_v0, 0.0 }
 0x229   : > { %v1407_v9 = vmax.f32 %v1287_v4, 0.0  ;;  %v2936_v4 = vld [vmem:[%s3126_s6] ss:$0 sm:$0xff] }
 0x22a   : > { %v1449_v10 = vpack.c.bf16 %v1409_v7, %v1408_v5 }
 0x22b   : > { %v1448_v11 = vpack.c.bf16 %v1407_v9, %v1406_v8  ;;  %v2300_v12 = vpop.f32.mrb[80].mxu1 }
 0x22c   : > { %v1308_v13 = vadd.f32 %v2300_v12, %v2864_v41  ;;  %v1299_v14 = vpop.f32.mrb[81].mxu1 }
 0x22d   : > { %v1300_v15 = vadd.f32 %v2864_v41, %v1299_v14  ;;  %v2301_v16 = vpop.f32.mrb[82].mxu1  ;;  %2374 = vmatprep.mubr.bf16.mxu0 %v1448_v11 }
 0x22e   : > { %v1311_v17 = vadd.f32 %v2301_v16, %v2864_v41  ;;  %v1302_v18 = vpop.f32.mrb[83].mxu1  ;;  %2375 = vmatmul.mubr.bf16.gmra.mrb[76].mxu0 %v1449_v10  ;;  %v1412_v20 = vmax.f32 %v1308_v13, 0.0 }
 0x22f   : > { %v1303_v19 = vadd.f32 %v2864_v41, %v1302_v18  ;;  %v1410_v22 = vmax.f32 %v1300_v15, 0.0 }
 0x230   : > { %v1413_v21 = vmax.f32 %v1311_v17, 0.0 }
 0x231   : > { %v1411_v23 = vmax.f32 %v1303_v19, 0.0 }
 0x232   : > { %v1451_v24 = vpack.c.bf16 %v1413_v21, %v1412_v20 }
 0x233   : > { %v1450_v42 = vpack.c.bf16 %v1411_v23, %v1410_v22  ;;  %v2304_v25 = vpop.f32.mrb[84].mxu1 }
 0x234   : > { %v1324_v26 = vadd.f32 %v2304_v25, %v2864_v41  ;;  %v1315_v27 = vpop.f32.mrb[85].mxu1 }
 0x235   : > { %v1316_v29 = vadd.f32 %v2864_v41, %v1315_v27  ;;  %v2305_v30 = vpop.f32.mrb[86].mxu1  ;;  %2378 = vmatprep.mubr.bf16.mxu0 %v1450_v42 }
 0x236   : > { %v1327_v33 = vadd.f32 %v2305_v30, %v2864_v41  ;;  %v1318_v37 = vpop.f32.mrb[87].mxu1  ;;  %2379 = vmatmul.mubr.bf16.gmra.mrb[80].mxu0 %v1451_v24  ;;  %v1416_v6 = vmax.f32 %v1324_v26, 0.0 }
 0x237   : > { %v1319_v3 = vadd.f32 %v2864_v41, %v1318_v37  ;;  %v1414_v34 = vmax.f32 %v1316_v29, 0.0 }
 0x238   : > { %v1417_v31 = vmax.f32 %v1327_v33, 0.0 }
 0x239   : > { %v1415_v62 = vmax.f32 %v1319_v3, 0.0 }
 0x23a   : > { %v1453_v1 = vpack.c.bf16 %v1417_v31, %v1416_v6 }
 0x23b   : > { %v1452_v28 = vpack.c.bf16 %v1415_v62, %v1414_v34  ;;  %v2308_v32 = vpop.f32.mrb[88].mxu1 }
 0x23c   : > { %v1340_v35 = vadd.f32 %v2308_v32, %v2864_v41  ;;  %v1331_v36 = vpop.f32.mrb[89].mxu1 }
 0x23d   : > { %v1332_v38 = vadd.f32 %v2864_v41, %v1331_v36  ;;  %v2309_v39 = vpop.f32.mrb[90].mxu1  ;;  %2382 = vmatprep.mubr.bf16.mxu0 %v1452_v28 }
 0x23e   : > { %v1343_v40 = vadd.f32 %v2309_v39, %v2864_v41  ;;  %v1334_v43 = vpop.f32.mrb[91].mxu1  ;;  %2383 = vmatmul.mubr.bf16.gmra.mrb[84].mxu0 %v1453_v1  ;;  %v1420_v45 = vmax.f32 %v1340_v35, 0.0 }
 0x23f   : > { %v1335_v44 = vadd.f32 %v2864_v41, %v1334_v43  ;;  %v1418_v47 = vmax.f32 %v1332_v38, 0.0 }
 0x240   : > { %v1421_v46 = vmax.f32 %v1343_v40, 0.0 }
 0x241   : > { %v1419_v48 = vmax.f32 %v1335_v44, 0.0 }
 0x242   : > { %v1455_v49 = vpack.c.bf16 %v1421_v46, %v1420_v45 }
 0x243   : > { %v1454_v50 = vpack.c.bf16 %v1419_v48, %v1418_v47  ;;  %v2312_v51 = vpop.f32.mrb[92].mxu1 }
 0x244   : > { %v1356_v52 = vadd.f32 %v2312_v51, %v2864_v41  ;;  %v1347_v53 = vpop.f32.mrb[93].mxu1 }
 0x245   : > { %v1348_v54 = vadd.f32 %v2864_v41, %v1347_v53  ;;  %v2313_v55 = vpop.f32.mrb[94].mxu1  ;;  %2386 = vmatprep.mubr.bf16.mxu0 %v1454_v50 }
 0x246   : > { %v1359_v56 = vadd.f32 %v2313_v55, %v2864_v41  ;;  %v1350_v57 = vpop.f32.mrb[95].mxu1  ;;  %2387 = vmatmul.mubr.bf16.gmra.mrb[88].mxu0 %v1455_v49  ;;  %v1424_v59 = vmax.f32 %v1356_v52, 0.0 }
 0x247   : > { %v1351_v58 = vadd.f32 %v2864_v41, %v1350_v57  ;;  %v1422_v61 = vmax.f32 %v1348_v54, 0.0 }
 0x248   : > { %v1425_v60 = vmax.f32 %v1359_v56, 0.0 }
 0x249   : > { %v1423_v63 = vmax.f32 %v1351_v58, 0.0 }
 0x24a   : > { %v1457_v0 = vpack.c.bf16 %v1425_v60, %v1424_v59 }
 0x24b   : > { %v1456_v2 = vpack.c.bf16 %v1423_v63, %v1422_v61 }
 0x24d   : > { %2390 = vmatprep.mubr.bf16.mxu0 %v1456_v2 }
 0x24e   : > { %2391 = vmatmul.mubr.bf16.gmra.mrb[92].mxu0 %v1457_v0 }
 0x2a9   : > { %v2332_v5 = vpop.f32.mrb[32].mxu0 }
 0x2aa   : > { %v1572_v7 = vadd.f32 %v2332_v5, %v2936_v4  ;;  %v1563_v41 = vpop.f32.mrb[33].mxu0 }
 0x2ab   : > { %v1564_v8 = vadd.f32 %v2936_v4, %v1563_v41  ;;  %v2333_v9 = vpop.f32.mrb[34].mxu0 }
 0x2ac   : > { %1820 = vst [vmem:[%s2940_s18 + $0x10] sm:$0xff] %v1572_v7  ;;  %v1575_v10 = vadd.f32 %v2333_v9, %v2936_v4  ;;  %v1566_v11 = vpop.f32.mrb[35].mxu0 }
 0x2ad   : > { %1818 = vst [vmem:[%s2940_s18] sm:$0xff] %v1564_v8  ;;  %v1567_v12 = vadd.f32 %v2936_v4, %v1566_v11 }
 0x2ae   : > { %1821 = vst [vmem:[%s2940_s18 + $0x18] sm:$0xff] %v1575_v10 }
 0x2af   : > { %1819 = vst [vmem:[%s2940_s18 + $0x8] sm:$0xff] %v1567_v12 }
 0x2b1   : > { %v2336_v13 = vpop.f32.mrb[36].mxu0 }
 0x2b2   : > { %v1588_v14 = vadd.f32 %v2336_v13, %v2936_v4  ;;  %v1579_v15 = vpop.f32.mrb[37].mxu0 }
 0x2b3   : > { %v1580_v16 = vadd.f32 %v2936_v4, %v1579_v15  ;;  %v2337_v17 = vpop.f32.mrb[38].mxu0 }
 0x2b4   : > { %1824 = vst [vmem:[%s2940_s18 + $0x30] sm:$0xff] %v1588_v14  ;;  %v1591_v18 = vadd.f32 %v2337_v17, %v2936_v4  ;;  %v1582_v19 = vpop.f32.mrb[39].mxu0 }
 0x2b5   : > { %1822 = vst [vmem:[%s2940_s18 + $0x20] sm:$0xff] %v1580_v16  ;;  %v1583_v20 = vadd.f32 %v2936_v4, %v1582_v19 }
 0x2b6   : > { %1825 = vst [vmem:[%s2940_s18 + $0x38] sm:$0xff] %v1591_v18 }
 0x2b7   : > { %1823 = vst [vmem:[%s2940_s18 + $0x28] sm:$0xff] %v1583_v20 }
 0x2b9   : > { %v2340_v21 = vpop.f32.mrb[40].mxu0 }
 0x2ba   : > { %v1604_v22 = vadd.f32 %v2340_v21, %v2936_v4  ;;  %v1595_v23 = vpop.f32.mrb[41].mxu0 }
 0x2bb   : > { %v1596_v24 = vadd.f32 %v2936_v4, %v1595_v23  ;;  %v2341_v42 = vpop.f32.mrb[42].mxu0 }
 0x2bc   : > { %1828 = vst [vmem:[%s2940_s18 + $0x50] sm:$0xff] %v1604_v22  ;;  %v1607_v25 = vadd.f32 %v2341_v42, %v2936_v4  ;;  %v1598_v26 = vpop.f32.mrb[43].mxu0 }
 0x2bd   : > { %1826 = vst [vmem:[%s2940_s18 + $0x40] sm:$0xff] %v1596_v24  ;;  %v1599_v27 = vadd.f32 %v2936_v4, %v1598_v26 }
 0x2be   : > { %1829 = vst [vmem:[%s2940_s18 + $0x58] sm:$0xff] %v1607_v25 }
 0x2bf   : > { %1827 = vst [vmem:[%s2940_s18 + $0x48] sm:$0xff] %v1599_v27 }
 0x2c1   : > { %v2344_v29 = vpop.f32.mrb[44].mxu0 }
 0x2c2   : > { %v1620_v30 = vadd.f32 %v2344_v29, %v2936_v4  ;;  %v1611_v33 = vpop.f32.mrb[45].mxu0 }
 0x2c3   : > { %v1612_v37 = vadd.f32 %v2936_v4, %v1611_v33  ;;  %v2345_v3 = vpop.f32.mrb[46].mxu0 }
 0x2c4   : > { %1832 = vst [vmem:[%s2940_s18 + $0x70] sm:$0xff] %v1620_v30  ;;  %v1623_v6 = vadd.f32 %v2345_v3, %v2936_v4  ;;  %v1614_v31 = vpop.f32.mrb[47].mxu0 }
 0x2c5   : > { %1830 = vst [vmem:[%s2940_s18 + $0x60] sm:$0xff] %v1612_v37  ;;  %v1615_v34 = vadd.f32 %v2936_v4, %v1614_v31 }
 0x2c6   : > { %1833 = vst [vmem:[%s2940_s18 + $0x78] sm:$0xff] %v1623_v6 }
 0x2c7   : > { %1831 = vst [vmem:[%s2940_s18 + $0x68] sm:$0xff] %v1615_v34 }
 0x2c9   : > { %v2348_v62 = vpop.f32.mrb[48].mxu0 }
 0x2ca   : > { %v1636_v1 = vadd.f32 %v2348_v62, %v2936_v4  ;;  %v1627_v28 = vpop.f32.mrb[49].mxu0 }
 0x2cb   : > { %v1628_v32 = vadd.f32 %v2936_v4, %v1627_v28  ;;  %v2349_v35 = vpop.f32.mrb[50].mxu0 }
 0x2cc   : > { %1836 = vst [vmem:[%s2940_s18 + $0x90] sm:$0xff] %v1636_v1  ;;  %v1639_v36 = vadd.f32 %v2349_v35, %v2936_v4  ;;  %v1630_v38 = vpop.f32.mrb[51].mxu0 }
 0x2cd   : > { %1834 = vst [vmem:[%s2940_s18 + $0x80] sm:$0xff] %v1628_v32  ;;  %v1631_v39 = vadd.f32 %v2936_v4, %v1630_v38 }
 0x2ce   : > { %1837 = vst [vmem:[%s2940_s18 + $0x98] sm:$0xff] %v1639_v36 }
 0x2cf   : > { %1835 = vst [vmem:[%s2940_s18 + $0x88] sm:$0xff] %v1631_v39 }
 0x2d1   : > { %v2352_v40 = vpop.f32.mrb[52].mxu0 }
 0x2d2   : > { %v1652_v43 = vadd.f32 %v2352_v40, %v2936_v4  ;;  %v1643_v44 = vpop.f32.mrb[53].mxu0 }
 0x2d3   : > { %v1644_v45 = vadd.f32 %v2936_v4, %v1643_v44  ;;  %v2353_v46 = vpop.f32.mrb[54].mxu0 }
 0x2d4   : > { %1840 = vst [vmem:[%s2940_s18 + $0xb0] sm:$0xff] %v1652_v43  ;;  %v1655_v47 = vadd.f32 %v2353_v46, %v2936_v4  ;;  %v1646_v48 = vpop.f32.mrb[55].mxu0 }
 0x2d5   : > { %1838 = vst [vmem:[%s2940_s18 + $0xa0] sm:$0xff] %v1644_v45  ;;  %v1647_v49 = vadd.f32 %v2936_v4, %v1646_v48 }
 0x2d6   : > { %1841 = vst [vmem:[%s2940_s18 + $0xb8] sm:$0xff] %v1655_v47 }
 0x2d7   : > { %1839 = vst [vmem:[%s2940_s18 + $0xa8] sm:$0xff] %v1647_v49 }
 0x2d9   : > { %v2356_v50 = vpop.f32.mrb[56].mxu0 }
 0x2da   : > { %v1668_v51 = vadd.f32 %v2356_v50, %v2936_v4  ;;  %v1659_v52 = vpop.f32.mrb[57].mxu0 }
 0x2db   : > { %v1660_v53 = vadd.f32 %v2936_v4, %v1659_v52  ;;  %v2357_v54 = vpop.f32.mrb[58].mxu0 }
 0x2dc   : > { %1844 = vst [vmem:[%s2940_s18 + $0xd0] sm:$0xff] %v1668_v51  ;;  %v1671_v55 = vadd.f32 %v2357_v54, %v2936_v4  ;;  %v1662_v56 = vpop.f32.mrb[59].mxu0 }
 0x2dd   : > { %1842 = vst [vmem:[%s2940_s18 + $0xc0] sm:$0xff] %v1660_v53  ;;  %v1663_v57 = vadd.f32 %v2936_v4, %v1662_v56 }
 0x2de   : > { %1845 = vst [vmem:[%s2940_s18 + $0xd8] sm:$0xff] %v1671_v55 }
 0x2df   : > { %1843 = vst [vmem:[%s2940_s18 + $0xc8] sm:$0xff] %v1663_v57 }
 0x2e1   : > { %v2360_v58 = vpop.f32.mrb[60].mxu0 }
 0x2e2   : > { %v1684_v59 = vadd.f32 %v2360_v58, %v2936_v4  ;;  %v1675_v60 = vpop.f32.mrb[61].mxu0 }
 0x2e3   : > { %v1676_v61 = vadd.f32 %v2936_v4, %v1675_v60  ;;  %v2361_v63 = vpop.f32.mrb[62].mxu0 }
 0x2e4   : > { %1848 = vst [vmem:[%s2940_s18 + $0xf0] sm:$0xff] %v1684_v59  ;;  %v1687_v0 = vadd.f32 %v2361_v63, %v2936_v4  ;;  %v1678_v2 = vpop.f32.mrb[63].mxu0 }
 0x2e5   : > { %1846 = vst [vmem:[%s2940_s18 + $0xe0] sm:$0xff] %v1676_v61  ;;  %v1679_v5 = vadd.f32 %v2936_v4, %v1678_v2 }
 0x2e6   : > { %1849 = vst [vmem:[%s2940_s18 + $0xf8] sm:$0xff] %v1687_v0 }
 0x2e7   : > { %1847 = vst [vmem:[%s2940_s18 + $0xe8] sm:$0xff] %v1679_v5 }
 0x2e9   : > { %v2364_v7 = vpop.f32.mrb[64].mxu0 }
 0x2ea   : > { %v1700_v41 = vadd.f32 %v2364_v7, %v2936_v4  ;;  %v1691_v8 = vpop.f32.mrb[65].mxu0 }
 0x2eb   : > { %v1692_v9 = vadd.f32 %v2936_v4, %v1691_v8  ;;  %v2365_v10 = vpop.f32.mrb[66].mxu0 }
 0x2ec   : > { %1852 = vst [vmem:[%s2940_s18 + $0x110] sm:$0xff] %v1700_v41  ;;  %v1703_v11 = vadd.f32 %v2365_v10, %v2936_v4  ;;  %v1694_v12 = vpop.f32.mrb[67].mxu0 }
 0x2ed   : > { %1850 = vst [vmem:[%s2940_s18 + $0x100] sm:$0xff] %v1692_v9  ;;  %v1695_v13 = vadd.f32 %v2936_v4, %v1694_v12 }
 0x2ee   : > { %1853 = vst [vmem:[%s2940_s18 + $0x118] sm:$0xff] %v1703_v11 }
 0x2ef   : > { %1851 = vst [vmem:[%s2940_s18 + $0x108] sm:$0xff] %v1695_v13 }
 0x2f1   : > { %v2368_v14 = vpop.f32.mrb[68].mxu0 }
 0x2f2   : > { %v1716_v15 = vadd.f32 %v2368_v14, %v2936_v4  ;;  %v1707_v16 = vpop.f32.mrb[69].mxu0 }
 0x2f3   : > { %v1708_v17 = vadd.f32 %v2936_v4, %v1707_v16  ;;  %v2369_v18 = vpop.f32.mrb[70].mxu0 }
 0x2f4   : > { %1856 = vst [vmem:[%s2940_s18 + $0x130] sm:$0xff] %v1716_v15  ;;  %v1719_v19 = vadd.f32 %v2369_v18, %v2936_v4  ;;  %v1710_v20 = vpop.f32.mrb[71].mxu0 }
 0x2f5   : > { %1854 = vst [vmem:[%s2940_s18 + $0x120] sm:$0xff] %v1708_v17  ;;  %v1711_v21 = vadd.f32 %v2936_v4, %v1710_v20 }
 0x2f6   : > { %1857 = vst [vmem:[%s2940_s18 + $0x138] sm:$0xff] %v1719_v19 }
 0x2f7   : > { %1855 = vst [vmem:[%s2940_s18 + $0x128] sm:$0xff] %v1711_v21 }
 0x2f9   : > { %v2372_v22 = vpop.f32.mrb[72].mxu0 }
 0x2fa   : > { %v1732_v23 = vadd.f32 %v2372_v22, %v2936_v4  ;;  %v1723_v24 = vpop.f32.mrb[73].mxu0 }
 0x2fb   : > { %v1724_v42 = vadd.f32 %v2936_v4, %v1723_v24  ;;  %v2373_v25 = vpop.f32.mrb[74].mxu0 }
 0x2fc   : > { %1860 = vst [vmem:[%s2940_s18 + $0x150] sm:$0xff] %v1732_v23  ;;  %v1735_v26 = vadd.f32 %v2373_v25, %v2936_v4  ;;  %v1726_v27 = vpop.f32.mrb[75].mxu0 }
 0x2fd   : > { %1858 = vst [vmem:[%s2940_s18 + $0x140] sm:$0xff] %v1724_v42  ;;  %v1727_v29 = vadd.f32 %v2936_v4, %v1726_v27 }
 0x2fe   : > { %1861 = vst [vmem:[%s2940_s18 + $0x158] sm:$0xff] %v1735_v26 }
 0x2ff   : > { %1859 = vst [vmem:[%s2940_s18 + $0x148] sm:$0xff] %v1727_v29 }
 0x301   : > { %v2376_v30 = vpop.f32.mrb[76].mxu0 }
 0x302   : > { %v1748_v33 = vadd.f32 %v2376_v30, %v2936_v4  ;;  %v1739_v37 = vpop.f32.mrb[77].mxu0 }
 0x303   : > { %v1740_v3 = vadd.f32 %v2936_v4, %v1739_v37  ;;  %v2377_v6 = vpop.f32.mrb[78].mxu0 }
 0x304   : > { %1864 = vst [vmem:[%s2940_s18 + $0x170] sm:$0xff] %v1748_v33  ;;  %v1751_v31 = vadd.f32 %v2377_v6, %v2936_v4  ;;  %v1742_v34 = vpop.f32.mrb[79].mxu0 }
 0x305   : > { %1862 = vst [vmem:[%s2940_s18 + $0x160] sm:$0xff] %v1740_v3  ;;  %v1743_v62 = vadd.f32 %v2936_v4, %v1742_v34 }
 0x306   : > { %1865 = vst [vmem:[%s2940_s18 + $0x178] sm:$0xff] %v1751_v31 }
 0x307   : > { %1863 = vst [vmem:[%s2940_s18 + $0x168] sm:$0xff] %v1743_v62 }
 0x309   : > { %v2380_v1 = vpop.f32.mrb[80].mxu0 }
 0x30a   : > { %v1764_v28 = vadd.f32 %v2380_v1, %v2936_v4  ;;  %v1755_v32 = vpop.f32.mrb[81].mxu0 }
 0x30b   : > { %v1756_v35 = vadd.f32 %v2936_v4, %v1755_v32  ;;  %v2381_v36 = vpop.f32.mrb[82].mxu0 }
 0x30c   : > { %1868 = vst [vmem:[%s2940_s18 + $0x190] sm:$0xff] %v1764_v28  ;;  %v1767_v38 = vadd.f32 %v2381_v36, %v2936_v4  ;;  %v1758_v39 = vpop.f32.mrb[83].mxu0 }
 0x30d   : > { %1866 = vst [vmem:[%s2940_s18 + $0x180] sm:$0xff] %v1756_v35  ;;  %v1759_v40 = vadd.f32 %v2936_v4, %v1758_v39 }
 0x30e   : > { %1869 = vst [vmem:[%s2940_s18 + $0x198] sm:$0xff] %v1767_v38 }
 0x30f   : > { %1867 = vst [vmem:[%s2940_s18 + $0x188] sm:$0xff] %v1759_v40 }
 0x311   : > { %v2384_v43 = vpop.f32.mrb[84].mxu0 }
 0x312   : > { %v1780_v44 = vadd.f32 %v2384_v43, %v2936_v4  ;;  %v1771_v45 = vpop.f32.mrb[85].mxu0 }
 0x313   : > { %v1772_v46 = vadd.f32 %v2936_v4, %v1771_v45  ;;  %v2385_v47 = vpop.f32.mrb[86].mxu0 }
 0x314   : > { %1872 = vst [vmem:[%s2940_s18 + $0x1b0] sm:$0xff] %v1780_v44  ;;  %v1783_v48 = vadd.f32 %v2385_v47, %v2936_v4  ;;  %v1774_v49 = vpop.f32.mrb[87].mxu0 }
 0x315   : > { %1870 = vst [vmem:[%s2940_s18 + $0x1a0] sm:$0xff] %v1772_v46  ;;  %v1775_v50 = vadd.f32 %v2936_v4, %v1774_v49 }
 0x316   : > { %1873 = vst [vmem:[%s2940_s18 + $0x1b8] sm:$0xff] %v1783_v48 }
 0x317   : > { %1871 = vst [vmem:[%s2940_s18 + $0x1a8] sm:$0xff] %v1775_v50 }
 0x319   : > { %v2388_v51 = vpop.f32.mrb[88].mxu0 }
 0x31a   : > { %v1796_v52 = vadd.f32 %v2388_v51, %v2936_v4  ;;  %v1787_v53 = vpop.f32.mrb[89].mxu0 }
 0x31b   : > { %v1788_v54 = vadd.f32 %v2936_v4, %v1787_v53  ;;  %v2389_v55 = vpop.f32.mrb[90].mxu0 }
 0x31c   : > { %1876 = vst [vmem:[%s2940_s18 + $0x1d0] sm:$0xff] %v1796_v52  ;;  %v1799_v56 = vadd.f32 %v2389_v55, %v2936_v4  ;;  %v1790_v57 = vpop.f32.mrb[91].mxu0 }
 0x31d   : > { %1874 = vst [vmem:[%s2940_s18 + $0x1c0] sm:$0xff] %v1788_v54  ;;  %v1791_v58 = vadd.f32 %v2936_v4, %v1790_v57 }
 0x31e   : > { %1877 = vst [vmem:[%s2940_s18 + $0x1d8] sm:$0xff] %v1799_v56 }
 0x31f   : > { %1875 = vst [vmem:[%s2940_s18 + $0x1c8] sm:$0xff] %v1791_v58 }
 0x321   : > { %v2392_v59 = vpop.f32.mrb[92].mxu0 }
 0x322   : > { %v1812_v60 = vadd.f32 %v2392_v59, %v2936_v4  ;;  %v1803_v61 = vpop.f32.mrb[93].mxu0 }
 0x323   : > { %v1804_v63 = vadd.f32 %v2936_v4, %v1803_v61  ;;  %v2393_v0 = vpop.f32.mrb[94].mxu0 }
 0x324   : > { %1880 = vst [vmem:[%s2940_s18 + $0x1f0] sm:$0xff] %v1812_v60  ;;  %v1815_v2 = vadd.f32 %v2393_v0, %v2936_v4  ;;  %v1806_v5 = vpop.f32.mrb[95].mxu0 }
 0x325   : > { %1878 = vst [vmem:[%s2940_s18 + $0x1e0] sm:$0xff] %v1804_v63  ;;  %v1807_v7 = vadd.f32 %v2936_v4, %v1806_v5 }
 0x326   : > { %1881 = vst [vmem:[%s2940_s18 + $0x1f8] sm:$0xff] %v1815_v2 }
 0x327   : > { %1879 = vst [vmem:[%s2940_s18 + $0x1e8] sm:$0xff] %v1807_v7 }
 0x328   : > { %2499 = shalt.err (!%p2496_p3)
}
 0x329   : > { %s2500_s14 = scalar_lea.hbm %s3069_s29, 8192  ;;  %s2504_s17 = scalar_lea.hbm %s3127_s7, 16384 }
 0x32a   : > { %p2501_p4 = scmp.ne.s32.totalorder %s3069_s29, %s2500_s14  ;;  %p2505_p9 = scmp.lt.u32.totalorder %s3069_s29, %s3127_s7 }
 0x32b   : > { %p2506_p10 = scmp.lt.u32.totalorder %s2504_s17, %s2500_s14  ;;  %p2508_p12 = scmp.lt.u32.totalorder %s2500_s14, %s3069_s29 }
 0x32c   : > { %p2502_p7 = pnand %p2501_p4, %p2631_p5 }
 0x32d   : > { %p2507_p11 = por %p2506_p10, %p2505_p9 }
 0x32e   : > { %p2503_p8 = pneg %p2502_p7 }
 0x32f   : > { %p2509_p13 = por %p2508_p12, %p2507_p11 }
 0x331   : > { %p2510_p0 = pnand %p2509_p13, %p2503_p8 }
 0x333   : > { %2513 = shalt.err (!%p2510_p0)
}
 0x334   : > { %s2551_s22 = smov 128   ;;  %s2552_s23 = smov 8  }
 0x335   : > { %2396 = dma.vmem_to_hbm [thread:$0]  (%p2631_p5), %s3071_s20, 8192, %s3069_s29, %s3079_s28, %s2551_s22, %s2551_s22, %s2552_s23  }
 0x336 PF: > { %p2402_p1 = scmp.ge.s32.totalorder %s2548_s27, 2  ;;  %s1911_s21 = sand.u32 1, %s2536_s24  }
 0x337   : > { %s1912_s8 = scalar_lea.sflag [#allocation3], %s1911_s21 }
 0x338   : > { %p2399_p2 = pnand %p2402_p1, %p2635_p6 }
 0x33a   : > { %2531 = dma.done.wait (!%p2399_p2), %s1912_s8, 8192  }
 0x33b   : > { %2533 = vsyncadd (!%p2399_p2), %s1912_s8, 4294959104  ;;  %p17_p3 = scmp.ge.s32.totalorder %s2618_s30, 4   ;;  %s3130_s24 = smov %s2540_s25 }
 0x33c   : > { %s3131_s25 = smov %s2544_s26  ;;  %s3132_s26 = smov %s2629_s10 }
 0x33d   : > { %s3133_s27 = smov %s2618_s30  ;;  %19 = sbr.rel (!%p17_p3) target bundleno = 3 (0x3), region = 83 }
 0x344   :  { %1917 = vsyncpa [#allocation3], 1 }
 0x345   :  { %1919 = vsyncpa [#allocation3 + $0x1], 1 }

</bundles_post_ra>
